<compile_context>
chip_gen: v7x
topology: tpu7x:2x2x1
jax: 0.10.0
libtpu: 0.0.40
codegen_flags: <defaults>
</compile_context>

<pallas_src>
import functools

import jax
import jax.numpy as jnp
from jax import lax
from jax.experimental import pallas as pl
from jax.experimental.pallas import tpu as pltpu


def _attention_kernel(x_ref, wqkv_ref, wproj_ref, bproj_ref, o_ref, ctx_ref,
                      *, num_heads, seq_len, scale):
    """One grid step = `block_b` whole batch elements, flattened into M rows.

    x_ref/o_ref : (M, C) with M = block_b * N   (lane-dense, C multiple of 128)
    wqkv_ref    : (C, 3C)   resident fused QKV weight
    wproj_ref   : (C, C)    resident output-projection weight
    bproj_ref   : (1, C)    output-projection bias
    ctx_ref     : (M, C)    VMEM scratch for concatenated per-head context
    """
    M, C = x_ref.shape
    H = num_heads
    N = seq_len
    BB = M // N                       # batches in this tile
    Dh = C // H
    dt = x_ref.dtype                  # MXU operand dtype; accumulation in f32

    # --- Fused QKV projection: full-C matmul, fills the MXU output dim. ---
    qkv = jnp.dot(x_ref[...], wqkv_ref[...],
                  preferred_element_type=jnp.float32)          # (M, 3C) f32

    # --- Per-(batch, head) attention.  Small static trip counts -> unrolled
    # Python loop so every row/lane slice offset is a compile-time constant.
    # TODO(synk): for long sequences (N >~ 2K) replace the materialized (N, N)
    # score matrix with flash-style KV tiling (running max/sum); mandatory
    # ~2x earlier on v7x (64 MiB VMEM).
    for b in range(BB):
        r0 = b * N
        for h in range(H):
            c0 = h * Dh
            # Fold the softmax scale into q (cheap side: N*Dh elements).
            q = (qkv[r0:r0 + N, c0:c0 + Dh] * scale).astype(dt)          # (N, Dh)
            k = qkv[r0:r0 + N, C + c0:C + c0 + Dh].astype(dt)            # (N, Dh)
            v = qkv[r0:r0 + N, 2 * C + c0:2 * C + c0 + Dh].astype(dt)    # (N, Dh)

            # Scores: contract over Dh directly (no explicit k transpose).
            s = lax.dot_general(q, k, (((1,), (1,)), ((), ())),
                                preferred_element_type=jnp.float32)      # (N, N)

            # Numerically-stable softmax in f32 (v5e has no bf16 VPU/EUP);
            # the divide becomes an EUP reciprocal (otherwise-idle slot).
            # TODO(synk): on v6e/v7x a bf16 exp after max-subtraction could
            # halve EUP pressure; kept f32 here for v5e parity.
            s_max = jnp.max(s, axis=-1, keepdims=True)
            p = jnp.exp(s - s_max)
            denom = jnp.sum(p, axis=-1, keepdims=True)
            p = (p * pl.reciprocal(denom, approx=True)).astype(dt)

            # TODO(synk): attn_dropout / proj_dropout are identity (eval mode).
            ctx = jnp.dot(p, v, preferred_element_type=jnp.float32)      # (N, Dh)

            # Stage this head's context at its lane offset (no concatenate,
            # no K=Dh output-projection matmuls).
            ctx_ref[r0:r0 + N, c0:c0 + Dh] = ctx.astype(ctx_ref.dtype)

    # --- Single fused output projection over the whole tile (K = C). ---
    out = jnp.dot(ctx_ref[...], wproj_ref[...],
                  preferred_element_type=jnp.float32)                    # (M, C)
    o_ref[...] = (out + bproj_ref[...].astype(jnp.float32)).astype(o_ref.dtype)


def _pick_block_b(B, N):
    """Batches per grid step: target ~256 M-rows to fill the MXU M dimension."""
    target = max(1, 256 // max(N, 1))
    bb = max(1, min(B, target))
    while B % bb != 0:
        bb -= 1
    if (bb * N) % 8 != 0:     # keep the M tile sublane-aligned, else take all of M
        bb = B
    return bb


def attention_forward(x, w_qkv, w_proj, b_proj, *, num_heads):
    """x: (B, N, C); w_qkv: (C, 3C); w_proj: (C, C); b_proj: (1, C).

    Weights are (in, out); the kernel computes y = x @ W (+ b).
    TODO(synk): the module's optional `mask` argument is not supported
    (mask=None path only).
    """
    B, N, C = x.shape
    H = num_heads
    Dh = C // H
    scale = float(Dh) ** -0.5

    block_b = _pick_block_b(B, N)
    tile_m = block_b * N
    M = B * N
    x2 = x.reshape(M, C)              # fold batch into the matmul M dimension

    kernel = functools.partial(_attention_kernel, num_heads=H, seq_len=N,
                               scale=scale)

    # VMEM budget derived from actual block bytes (double-buffered x/out,
    # resident weights, ctx scratch, f32 qkv + score intermediates), with
    # 2x headroom, capped at 48 MiB (safe on v7x's 64 MiB as well as v5e/v6e).
    itemsize = jnp.dtype(x.dtype).itemsize
    blk_bytes = tile_m * C * itemsize
    w_bytes = (C * 3 * C + C * C + C) * itemsize
    scratch_bytes = (tile_m * C * itemsize          # ctx scratch
                     + tile_m * 3 * C * 4           # f32 qkv intermediate
                     + 2 * N * N * 4)               # score / prob tiles (f32)
    est = 2 * (2 * blk_bytes) + 2 * w_bytes + scratch_bytes
    vmem_limit = int(min(max(2 * est, 16 * 1024 * 1024), 48 * 1024 * 1024))

    out2 = pl.pallas_call(
        kernel,
        out_shape=jax.ShapeDtypeStruct((M, C), x.dtype),
        grid_spec=pltpu.PrefetchScalarGridSpec(
            num_scalar_prefetch=0,
            grid=(M // tile_m,),
            in_specs=[
                pl.BlockSpec((tile_m, C), lambda i: (i, 0)),   # x rows for this step
                pl.BlockSpec((C, 3 * C), lambda i: (0, 0)),    # fused qkv W (resident)
                pl.BlockSpec((C, C), lambda i: (0, 0)),        # proj W (resident)
                pl.BlockSpec((1, C), lambda i: (0, 0)),        # proj bias
            ],
            out_specs=pl.BlockSpec((tile_m, C), lambda i: (i, 0)),
            scratch_shapes=[pltpu.VMEM((tile_m, C), x.dtype)],  # ctx staging
        ),
        compiler_params=pltpu.CompilerParams(
            dimension_semantics=("parallel",),      # M tiles shard across TCs
            vmem_limit_bytes=vmem_limit,
        ),
    )(x2, w_qkv, w_proj, b_proj)
    return out2.reshape(B, N, C)


def attention_reference(x, w_qkv, w_proj, b_proj, *, num_heads):
    """Pure-JAX reference mirroring the PyTorch forward (eval mode)."""
    B, N, C = x.shape
    Dh = C // num_heads
    scale = float(Dh) ** -0.5
    qkv = x @ w_qkv                                           # (B, N, 3C)
    qkv = qkv.reshape(B, N, 3, num_heads, Dh).transpose(2, 0, 3, 1, 4)
    q, k, v = qkv[0], qkv[1], qkv[2]                          # (B, H, N, Dh)
    attn = jnp.einsum("bhnd,bhmd->bhnm", q, k) * scale
    attn = jax.nn.softmax(attn, axis=-1)
    ctx = jnp.einsum("bhnm,bhmd->bhnd", attn, v)              # (B, H, N, Dh)
    ctx = ctx.transpose(0, 2, 1, 3).reshape(B, N, C)
    return ctx @ w_proj + b_proj[0]


if __name__ == "__main__":
    # Small shapes consistent with the module; C=128 keeps every block lane-dense.
    B, N, C = 2, 16, 128
    num_heads = 8                      # head_dim = 16

    key = jax.random.PRNGKey(0)
    kx, kq, kp, kb = jax.random.split(key, 4)

    x = jax.random.normal(kx, (B, N, C), dtype=jnp.float32)
    # Deterministic parameter init (torch.nn.Linear-like scale), stored as (in, out).
    w_qkv = jax.random.normal(kq, (C, 3 * C), dtype=jnp.float32) * (C ** -0.5)
    w_proj = jax.random.normal(kp, (C, C), dtype=jnp.float32) * (C ** -0.5)
    b_proj = jax.random.normal(kb, (1, C), dtype=jnp.float32) * 0.01

    ref = attention_reference(x, w_qkv, w_proj, b_proj, num_heads=num_heads)

    # f32 run (tolerance allows for the EUP approximate reciprocal).
    out = attention_forward(x, w_qkv, w_proj, b_proj, num_heads=num_heads)
    out = jax.block_until_ready(out)
    assert out.shape == (B, N, C)
    assert jnp.allclose(out, ref, rtol=1e-2, atol=1e-2), "f32 mismatch vs reference"

    # bf16 run: bf16 MXU operands / bf16-resident weights, f32 softmax & accumulation.
    out_bf16 = attention_forward(
        x.astype(jnp.bfloat16), w_qkv.astype(jnp.bfloat16),
        w_proj.astype(jnp.bfloat16), b_proj.astype(jnp.bfloat16),
        num_heads=num_heads)
    out_bf16 = jax.block_until_ready(out_bf16)
    assert out_bf16.shape == (B, N, C) and out_bf16.dtype == jnp.bfloat16
    assert jnp.allclose(out_bf16.astype(jnp.float32), ref, rtol=1e-1, atol=1e-1), \
        "bf16 mismatch vs reference"

    print("KERNEL_OK")
</pallas_src>

<mosaic_0001>
module attributes {stable_mosaic.version = 11 : i64} {
  func.func @_attention_kernel(%arg0: i32, %arg1: memref<32x128xf32, #tpu.memory_space<vmem>>, %arg2: memref<128x384xf32, #tpu.memory_space<vmem>>, %arg3: memref<128x128xf32, #tpu.memory_space<vmem>>, %arg4: memref<1x128xf32, #tpu.memory_space<vmem>>, %arg5: memref<32x128xf32, #tpu.memory_space<vmem>>, %arg6: memref<32x128xf32, #tpu.memory_space<vmem>>) attributes {dimension_semantics = [#tpu.dimension_semantics<parallel>], iteration_bounds = array<i64: 1>, scalar_prefetch = 0 : i64, scratch_operands = 1 : i64, tpu.core_type = #tpu.core_type<tc>, window_params = [{transform_indices = @transform_0, window_bounds = array<i64: 32, 128>}, {pipeline_mode = #tpu.pipeline_mode<synchronous>, transform_indices = @transform_1, window_bounds = array<i64: 128, 384>}, {pipeline_mode = #tpu.pipeline_mode<synchronous>, transform_indices = @transform_2, window_bounds = array<i64: 128, 128>}, {pipeline_mode = #tpu.pipeline_mode<synchronous>, transform_indices = @transform_3, window_bounds = array<i64: 1, 128>}, {transform_indices = @transform_4, window_bounds = array<i64: 32, 128>}]} {
    %c0 = arith.constant 0 : index
    %c0_0 = arith.constant 0 : index
    %0 = vector.load %arg1[%c0, %c0_0] : memref<32x128xf32, #tpu.memory_space<vmem>>, vector<32x128xf32>
    %c0_1 = arith.constant 0 : index
    %c0_2 = arith.constant 0 : index
    %1 = vector.load %arg2[%c0_1, %c0_2] : memref<128x384xf32, #tpu.memory_space<vmem>>, vector<128x384xf32>
    %cst = arith.constant dense<0.000000e+00> : vector<32x384xf32>
    %2 = tpu.matmul %0, %1, %cst {dimension_numbers = #tpu.dot_dimension_numbers<[1], [0], [0], [1], [0, 0, 1, 1], [], []>} : vector<32x128xf32>, vector<128x384xf32>, vector<32x384xf32> -> vector<32x384xf32>
    %3 = vector.extract_strided_slice %2 {offsets = [0, 0], sizes = [16, 16], strides = [1, 1]} : vector<32x384xf32> to vector<16x16xf32>
    %cst_3 = arith.constant 2.500000e-01 : f32
    %4 = vector.broadcast %cst_3 : f32 to vector<16x16xf32>
    %5 = arith.mulf %3, %4 : vector<16x16xf32>
    %6 = vector.extract_strided_slice %2 {offsets = [0, 128], sizes = [16, 16], strides = [1, 1]} : vector<32x384xf32> to vector<16x16xf32>
    %7 = vector.extract_strided_slice %2 {offsets = [0, 256], sizes = [16, 16], strides = [1, 1]} : vector<32x384xf32> to vector<16x16xf32>
    %cst_4 = arith.constant dense<0.000000e+00> : vector<16x16xf32>
    %8 = tpu.matmul %5, %6, %cst_4 {dimension_numbers = #tpu.dot_dimension_numbers<[1], [1], [0], [0], [0, 0, 1, 0], [], []>} : vector<16x16xf32>, vector<16x16xf32>, vector<16x16xf32> -> vector<16x16xf32>
    %cst_5 = arith.constant dense<0xFF800000> : vector<16xf32>
    %9 = vector.multi_reduction <maximumf>, %8, %cst_5 [1] : vector<16x16xf32> to vector<16xf32>
    %10 = vector.shape_cast %9 : vector<16xf32> to vector<16x1xf32>
    %11 = vector.broadcast %10 : vector<16x1xf32> to vector<16x16xf32>
    %12 = arith.subf %8, %11 : vector<16x16xf32>
    %13 = math.exp %12 : vector<16x16xf32>
    %cst_6 = arith.constant dense<0.000000e+00> : vector<16xf32>
    %14 = vector.multi_reduction <add>, %13, %cst_6 [1] : vector<16x16xf32> to vector<16xf32>
    %15 = vector.shape_cast %14 : vector<16xf32> to vector<16x1xf32>
    %16 = tpu.reciprocal %15 {approx = true} : vector<16x1xf32> -> vector<16x1xf32>
    %17 = vector.broadcast %16 : vector<16x1xf32> to vector<16x16xf32>
    %18 = arith.mulf %13, %17 : vector<16x16xf32>
    %cst_7 = arith.constant dense<0.000000e+00> : vector<16x16xf32>
    %19 = tpu.matmul %18, %7, %cst_7 {dimension_numbers = #tpu.dot_dimension_numbers<[1], [0], [0], [1], [0, 0, 1, 1], [], []>} : vector<16x16xf32>, vector<16x16xf32>, vector<16x16xf32> -> vector<16x16xf32>
    %c0_8 = arith.constant 0 : index
    %c0_9 = arith.constant 0 : index
    %20 = vector.load %arg6[%c0_8, %c0_9] : memref<32x128xf32, #tpu.memory_space<vmem>>, vector<16x16xf32>
    tpu.vector_store %arg6[%c0_8, %c0_9], %19 {strides = array<i32>} : memref<32x128xf32, #tpu.memory_space<vmem>>, vector<16x16xf32>,
    %21 = vector.extract_strided_slice %2 {offsets = [0, 16], sizes = [16, 16], strides = [1, 1]} : vector<32x384xf32> to vector<16x16xf32>
    %cst_10 = arith.constant 2.500000e-01 : f32
    %22 = vector.broadcast %cst_10 : f32 to vector<16x16xf32>
    %23 = arith.mulf %21, %22 : vector<16x16xf32>
    %24 = vector.extract_strided_slice %2 {offsets = [0, 144], sizes = [16, 16], strides = [1, 1]} : vector<32x384xf32> to vector<16x16xf32>
    %25 = vector.extract_strided_slice %2 {offsets = [0, 272], sizes = [16, 16], strides = [1, 1]} : vector<32x384xf32> to vector<16x16xf32>
    %cst_11 = arith.constant dense<0.000000e+00> : vector<16x16xf32>
    %26 = tpu.matmul %23, %24, %cst_11 {dimension_numbers = #tpu.dot_dimension_numbers<[1], [1], [0], [0], [0, 0, 1, 0], [], []>} : vector<16x16xf32>, vector<16x16xf32>, vector<16x16xf32> -> vector<16x16xf32>
    %cst_12 = arith.constant dense<0xFF800000> : vector<16xf32>
    %27 = vector.multi_reduction <maximumf>, %26, %cst_12 [1] : vector<16x16xf32> to vector<16xf32>
    %28 = vector.shape_cast %27 : vector<16xf32> to vector<16x1xf32>
    %29 = vector.broadcast %28 : vector<16x1xf32> to vector<16x16xf32>
    %30 = arith.subf %26, %29 : vector<16x16xf32>
    %31 = math.exp %30 : vector<16x16xf32>
    %cst_13 = arith.constant dense<0.000000e+00> : vector<16xf32>
    %32 = vector.multi_reduction <add>, %31, %cst_13 [1] : vector<16x16xf32> to vector<16xf32>
    %33 = vector.shape_cast %32 : vector<16xf32> to vector<16x1xf32>
    %34 = tpu.reciprocal %33 {approx = true} : vector<16x1xf32> -> vector<16x1xf32>
    %35 = vector.broadcast %34 : vector<16x1xf32> to vector<16x16xf32>
    %36 = arith.mulf %31, %35 : vector<16x16xf32>
    %cst_14 = arith.constant dense<0.000000e+00> : vector<16x16xf32>
    %37 = tpu.matmul %36, %25, %cst_14 {dimension_numbers = #tpu.dot_dimension_numbers<[1], [0], [0], [1], [0, 0, 1, 1], [], []>} : vector<16x16xf32>, vector<16x16xf32>, vector<16x16xf32> -> vector<16x16xf32>
    %c0_15 = arith.constant 0 : index
    %c16 = arith.constant 16 : index
    %38 = vector.load %arg6[%c0_15, %c16] : memref<32x128xf32, #tpu.memory_space<vmem>>, vector<16x16xf32>
    tpu.vector_store %arg6[%c0_15, %c16], %37 {strides = array<i32>} : memref<32x128xf32, #tpu.memory_space<vmem>>, vector<16x16xf32>,
    %39 = vector.extract_strided_slice %2 {offsets = [0, 32], sizes = [16, 16], strides = [1, 1]} : vector<32x384xf32> to vector<16x16xf32>
    %cst_16 = arith.constant 2.500000e-01 : f32
    %40 = vector.broadcast %cst_16 : f32 to vector<16x16xf32>
    %41 = arith.mulf %39, %40 : vector<16x16xf32>
    %42 = vector.extract_strided_slice %2 {offsets = [0, 160], sizes = [16, 16], strides = [1, 1]} : vector<32x384xf32> to vector<16x16xf32>
    %43 = vector.extract_strided_slice %2 {offsets = [0, 288], sizes = [16, 16], strides = [1, 1]} : vector<32x384xf32> to vector<16x16xf32>
    %cst_17 = arith.constant dense<0.000000e+00> : vector<16x16xf32>
    %44 = tpu.matmul %41, %42, %cst_17 {dimension_numbers = #tpu.dot_dimension_numbers<[1], [1], [0], [0], [0, 0, 1, 0], [], []>} : vector<16x16xf32>, vector<16x16xf32>, vector<16x16xf32> -> vector<16x16xf32>
    %cst_18 = arith.constant dense<0xFF800000> : vector<16xf32>
    %45 = vector.multi_reduction <maximumf>, %44, %cst_18 [1] : vector<16x16xf32> to vector<16xf32>
    %46 = vector.shape_cast %45 : vector<16xf32> to vector<16x1xf32>
    %47 = vector.broadcast %46 : vector<16x1xf32> to vector<16x16xf32>
    %48 = arith.subf %44, %47 : vector<16x16xf32>
    %49 = math.exp %48 : vector<16x16xf32>
    %cst_19 = arith.constant dense<0.000000e+00> : vector<16xf32>
    %50 = vector.multi_reduction <add>, %49, %cst_19 [1] : vector<16x16xf32> to vector<16xf32>
    %51 = vector.shape_cast %50 : vector<16xf32> to vector<16x1xf32>
    %52 = tpu.reciprocal %51 {approx = true} : vector<16x1xf32> -> vector<16x1xf32>
    %53 = vector.broadcast %52 : vector<16x1xf32> to vector<16x16xf32>
    %54 = arith.mulf %49, %53 : vector<16x16xf32>
    %cst_20 = arith.constant dense<0.000000e+00> : vector<16x16xf32>
    %55 = tpu.matmul %54, %43, %cst_20 {dimension_numbers = #tpu.dot_dimension_numbers<[1], [0], [0], [1], [0, 0, 1, 1], [], []>} : vector<16x16xf32>, vector<16x16xf32>, vector<16x16xf32> -> vector<16x16xf32>
    %c0_21 = arith.constant 0 : index
    %c32 = arith.constant 32 : index
    %56 = vector.load %arg6[%c0_21, %c32] : memref<32x128xf32, #tpu.memory_space<vmem>>, vector<16x16xf32>
    tpu.vector_store %arg6[%c0_21, %c32], %55 {strides = array<i32>} : memref<32x128xf32, #tpu.memory_space<vmem>>, vector<16x16xf32>,
    %57 = vector.extract_strided_slice %2 {offsets = [0, 48], sizes = [16, 16], strides = [1, 1]} : vector<32x384xf32> to vector<16x16xf32>
    %cst_22 = arith.constant 2.500000e-01 : f32
    %58 = vector.broadcast %cst_22 : f32 to vector<16x16xf32>
    %59 = arith.mulf %57, %58 : vector<16x16xf32>
    %60 = vector.extract_strided_slice %2 {offsets = [0, 176], sizes = [16, 16], strides = [1, 1]} : vector<32x384xf32> to vector<16x16xf32>
    %61 = vector.extract_strided_slice %2 {offsets = [0, 304], sizes = [16, 16], strides = [1, 1]} : vector<32x384xf32> to vector<16x16xf32>
    %cst_23 = arith.constant dense<0.000000e+00> : vector<16x16xf32>
    %62 = tpu.matmul %59, %60, %cst_23 {dimension_numbers = #tpu.dot_dimension_numbers<[1], [1], [0], [0], [0, 0, 1, 0], [], []>} : vector<16x16xf32>, vector<16x16xf32>, vector<16x16xf32> -> vector<16x16xf32>
    %cst_24 = arith.constant dense<0xFF800000> : vector<16xf32>
    %63 = vector.multi_reduction <maximumf>, %62, %cst_24 [1] : vector<16x16xf32> to vector<16xf32>
    %64 = vector.shape_cast %63 : vector<16xf32> to vector<16x1xf32>
    %65 = vector.broadcast %64 : vector<16x1xf32> to vector<16x16xf32>
    %66 = arith.subf %62, %65 : vector<16x16xf32>
    %67 = math.exp %66 : vector<16x16xf32>
    %cst_25 = arith.constant dense<0.000000e+00> : vector<16xf32>
    %68 = vector.multi_reduction <add>, %67, %cst_25 [1] : vector<16x16xf32> to vector<16xf32>
    %69 = vector.shape_cast %68 : vector<16xf32> to vector<16x1xf32>
    %70 = tpu.reciprocal %69 {approx = true} : vector<16x1xf32> -> vector<16x1xf32>
    %71 = vector.broadcast %70 : vector<16x1xf32> to vector<16x16xf32>
    %72 = arith.mulf %67, %71 : vector<16x16xf32>
    %cst_26 = arith.constant dense<0.000000e+00> : vector<16x16xf32>
    %73 = tpu.matmul %72, %61, %cst_26 {dimension_numbers = #tpu.dot_dimension_numbers<[1], [0], [0], [1], [0, 0, 1, 1], [], []>} : vector<16x16xf32>, vector<16x16xf32>, vector<16x16xf32> -> vector<16x16xf32>
    %c0_27 = arith.constant 0 : index
    %c48 = arith.constant 48 : index
    %74 = vector.load %arg6[%c0_27, %c48] : memref<32x128xf32, #tpu.memory_space<vmem>>, vector<16x16xf32>
    tpu.vector_store %arg6[%c0_27, %c48], %73 {strides = array<i32>} : memref<32x128xf32, #tpu.memory_space<vmem>>, vector<16x16xf32>,
    %75 = vector.extract_strided_slice %2 {offsets = [0, 64], sizes = [16, 16], strides = [1, 1]} : vector<32x384xf32> to vector<16x16xf32>
    %cst_28 = arith.constant 2.500000e-01 : f32
    %76 = vector.broadcast %cst_28 : f32 to vector<16x16xf32>
    %77 = arith.mulf %75, %76 : vector<16x16xf32>
    %78 = vector.extract_strided_slice %2 {offsets = [0, 192], sizes = [16, 16], strides = [1, 1]} : vector<32x384xf32> to vector<16x16xf32>
    %79 = vector.extract_strided_slice %2 {offsets = [0, 320], sizes = [16, 16], strides = [1, 1]} : vector<32x384xf32> to vector<16x16xf32>
    %cst_29 = arith.constant dense<0.000000e+00> : vector<16x16xf32>
    %80 = tpu.matmul %77, %78, %cst_29 {dimension_numbers = #tpu.dot_dimension_numbers<[1], [1], [0], [0], [0, 0, 1, 0], [], []>} : vector<16x16xf32>, vector<16x16xf32>, vector<16x16xf32> -> vector<16x16xf32>
    %cst_30 = arith.constant dense<0xFF800000> : vector<16xf32>
    %81 = vector.multi_reduction <maximumf>, %80, %cst_30 [1] : vector<16x16xf32> to vector<16xf32>
    %82 = vector.shape_cast %81 : vector<16xf32> to vector<16x1xf32>
    %83 = vector.broadcast %82 : vector<16x1xf32> to vector<16x16xf32>
    %84 = arith.subf %80, %83 : vector<16x16xf32>
    %85 = math.exp %84 : vector<16x16xf32>
    %cst_31 = arith.constant dense<0.000000e+00> : vector<16xf32>
    %86 = vector.multi_reduction <add>, %85, %cst_31 [1] : vector<16x16xf32> to vector<16xf32>
    %87 = vector.shape_cast %86 : vector<16xf32> to vector<16x1xf32>
    %88 = tpu.reciprocal %87 {approx = true} : vector<16x1xf32> -> vector<16x1xf32>
    %89 = vector.broadcast %88 : vector<16x1xf32> to vector<16x16xf32>
    %90 = arith.mulf %85, %89 : vector<16x16xf32>
    %cst_32 = arith.constant dense<0.000000e+00> : vector<16x16xf32>
    %91 = tpu.matmul %90, %79, %cst_32 {dimension_numbers = #tpu.dot_dimension_numbers<[1], [0], [0], [1], [0, 0, 1, 1], [], []>} : vector<16x16xf32>, vector<16x16xf32>, vector<16x16xf32> -> vector<16x16xf32>
    %c0_33 = arith.constant 0 : index
    %c64 = arith.constant 64 : index
    %92 = vector.load %arg6[%c0_33, %c64] : memref<32x128xf32, #tpu.memory_space<vmem>>, vector<16x16xf32>
    tpu.vector_store %arg6[%c0_33, %c64], %91 {strides = array<i32>} : memref<32x128xf32, #tpu.memory_space<vmem>>, vector<16x16xf32>,
    %93 = vector.extract_strided_slice %2 {offsets = [0, 80], sizes = [16, 16], strides = [1, 1]} : vector<32x384xf32> to vector<16x16xf32>
    %cst_34 = arith.constant 2.500000e-01 : f32
    %94 = vector.broadcast %cst_34 : f32 to vector<16x16xf32>
    %95 = arith.mulf %93, %94 : vector<16x16xf32>
    %96 = vector.extract_strided_slice %2 {offsets = [0, 208], sizes = [16, 16], strides = [1, 1]} : vector<32x384xf32> to vector<16x16xf32>
    %97 = vector.extract_strided_slice %2 {offsets = [0, 336], sizes = [16, 16], strides = [1, 1]} : vector<32x384xf32> to vector<16x16xf32>
    %cst_35 = arith.constant dense<0.000000e+00> : vector<16x16xf32>
    %98 = tpu.matmul %95, %96, %cst_35 {dimension_numbers = #tpu.dot_dimension_numbers<[1], [1], [0], [0], [0, 0, 1, 0], [], []>} : vector<16x16xf32>, vector<16x16xf32>, vector<16x16xf32> -> vector<16x16xf32>
    %cst_36 = arith.constant dense<0xFF800000> : vector<16xf32>
    %99 = vector.multi_reduction <maximumf>, %98, %cst_36 [1] : vector<16x16xf32> to vector<16xf32>
    %100 = vector.shape_cast %99 : vector<16xf32> to vector<16x1xf32>
    %101 = vector.broadcast %100 : vector<16x1xf32> to vector<16x16xf32>
    %102 = arith.subf %98, %101 : vector<16x16xf32>
    %103 = math.exp %102 : vector<16x16xf32>
    %cst_37 = arith.constant dense<0.000000e+00> : vector<16xf32>
    %104 = vector.multi_reduction <add>, %103, %cst_37 [1] : vector<16x16xf32> to vector<16xf32>
    %105 = vector.shape_cast %104 : vector<16xf32> to vector<16x1xf32>
    %106 = tpu.reciprocal %105 {approx = true} : vector<16x1xf32> -> vector<16x1xf32>
    %107 = vector.broadcast %106 : vector<16x1xf32> to vector<16x16xf32>
    %108 = arith.mulf %103, %107 : vector<16x16xf32>
    %cst_38 = arith.constant dense<0.000000e+00> : vector<16x16xf32>
    %109 = tpu.matmul %108, %97, %cst_38 {dimension_numbers = #tpu.dot_dimension_numbers<[1], [0], [0], [1], [0, 0, 1, 1], [], []>} : vector<16x16xf32>, vector<16x16xf32>, vector<16x16xf32> -> vector<16x16xf32>
    %c0_39 = arith.constant 0 : index
    %c80 = arith.constant 80 : index
    %110 = vector.load %arg6[%c0_39, %c80] : memref<32x128xf32, #tpu.memory_space<vmem>>, vector<16x16xf32>
    tpu.vector_store %arg6[%c0_39, %c80], %109 {strides = array<i32>} : memref<32x128xf32, #tpu.memory_space<vmem>>, vector<16x16xf32>,
    %111 = vector.extract_strided_slice %2 {offsets = [0, 96], sizes = [16, 16], strides = [1, 1]} : vector<32x384xf32> to vector<16x16xf32>
    %cst_40 = arith.constant 2.500000e-01 : f32
    %112 = vector.broadcast %cst_40 : f32 to vector<16x16xf32>
    %113 = arith.mulf %111, %112 : vector<16x16xf32>
    %114 = vector.extract_strided_slice %2 {offsets = [0, 224], sizes = [16, 16], strides = [1, 1]} : vector<32x384xf32> to vector<16x16xf32>
    %115 = vector.extract_strided_slice %2 {offsets = [0, 352], sizes = [16, 16], strides = [1, 1]} : vector<32x384xf32> to vector<16x16xf32>
    %cst_41 = arith.constant dense<0.000000e+00> : vector<16x16xf32>
    %116 = tpu.matmul %113, %114, %cst_41 {dimension_numbers = #tpu.dot_dimension_numbers<[1], [1], [0], [0], [0, 0, 1, 0], [], []>} : vector<16x16xf32>, vector<16x16xf32>, vector<16x16xf32> -> vector<16x16xf32>
    %cst_42 = arith.constant dense<0xFF800000> : vector<16xf32>
    %117 = vector.multi_reduction <maximumf>, %116, %cst_42 [1] : vector<16x16xf32> to vector<16xf32>
    %118 = vector.shape_cast %117 : vector<16xf32> to vector<16x1xf32>
    %119 = vector.broadcast %118 : vector<16x1xf32> to vector<16x16xf32>
    %120 = arith.subf %116, %119 : vector<16x16xf32>
    %121 = math.exp %120 : vector<16x16xf32>
    %cst_43 = arith.constant dense<0.000000e+00> : vector<16xf32>
    %122 = vector.multi_reduction <add>, %121, %cst_43 [1] : vector<16x16xf32> to vector<16xf32>
    %123 = vector.shape_cast %122 : vector<16xf32> to vector<16x1xf32>
    %124 = tpu.reciprocal %123 {approx = true} : vector<16x1xf32> -> vector<16x1xf32>
    %125 = vector.broadcast %124 : vector<16x1xf32> to vector<16x16xf32>
    %126 = arith.mulf %121, %125 : vector<16x16xf32>
    %cst_44 = arith.constant dense<0.000000e+00> : vector<16x16xf32>
    %127 = tpu.matmul %126, %115, %cst_44 {dimension_numbers = #tpu.dot_dimension_numbers<[1], [0], [0], [1], [0, 0, 1, 1], [], []>} : vector<16x16xf32>, vector<16x16xf32>, vector<16x16xf32> -> vector<16x16xf32>
    %c0_45 = arith.constant 0 : index
    %c96 = arith.constant 96 : index
    %128 = vector.load %arg6[%c0_45, %c96] : memref<32x128xf32, #tpu.memory_space<vmem>>, vector<16x16xf32>
    tpu.vector_store %arg6[%c0_45, %c96], %127 {strides = array<i32>} : memref<32x128xf32, #tpu.memory_space<vmem>>, vector<16x16xf32>,
    %129 = vector.extract_strided_slice %2 {offsets = [0, 112], sizes = [16, 16], strides = [1, 1]} : vector<32x384xf32> to vector<16x16xf32>
    %cst_46 = arith.constant 2.500000e-01 : f32
    %130 = vector.broadcast %cst_46 : f32 to vector<16x16xf32>
    %131 = arith.mulf %129, %130 : vector<16x16xf32>
    %132 = vector.extract_strided_slice %2 {offsets = [0, 240], sizes = [16, 16], strides = [1, 1]} : vector<32x384xf32> to vector<16x16xf32>
    %133 = vector.extract_strided_slice %2 {offsets = [0, 368], sizes = [16, 16], strides = [1, 1]} : vector<32x384xf32> to vector<16x16xf32>
    %cst_47 = arith.constant dense<0.000000e+00> : vector<16x16xf32>
    %134 = tpu.matmul %131, %132, %cst_47 {dimension_numbers = #tpu.dot_dimension_numbers<[1], [1], [0], [0], [0, 0, 1, 0], [], []>} : vector<16x16xf32>, vector<16x16xf32>, vector<16x16xf32> -> vector<16x16xf32>
    %cst_48 = arith.constant dense<0xFF800000> : vector<16xf32>
    %135 = vector.multi_reduction <maximumf>, %134, %cst_48 [1] : vector<16x16xf32> to vector<16xf32>
    %136 = vector.shape_cast %135 : vector<16xf32> to vector<16x1xf32>
    %137 = vector.broadcast %136 : vector<16x1xf32> to vector<16x16xf32>
    %138 = arith.subf %134, %137 : vector<16x16xf32>
    %139 = math.exp %138 : vector<16x16xf32>
    %cst_49 = arith.constant dense<0.000000e+00> : vector<16xf32>
    %140 = vector.multi_reduction <add>, %139, %cst_49 [1] : vector<16x16xf32> to vector<16xf32>
    %141 = vector.shape_cast %140 : vector<16xf32> to vector<16x1xf32>
    %142 = tpu.reciprocal %141 {approx = true} : vector<16x1xf32> -> vector<16x1xf32>
    %143 = vector.broadcast %142 : vector<16x1xf32> to vector<16x16xf32>
    %144 = arith.mulf %139, %143 : vector<16x16xf32>
    %cst_50 = arith.constant dense<0.000000e+00> : vector<16x16xf32>
    %145 = tpu.matmul %144, %133, %cst_50 {dimension_numbers = #tpu.dot_dimension_numbers<[1], [0], [0], [1], [0, 0, 1, 1], [], []>} : vector<16x16xf32>, vector<16x16xf32>, vector<16x16xf32> -> vector<16x16xf32>
    %c0_51 = arith.constant 0 : index
    %c112 = arith.constant 112 : index
    %146 = vector.load %arg6[%c0_51, %c112] : memref<32x128xf32, #tpu.memory_space<vmem>>, vector<16x16xf32>
    tpu.vector_store %arg6[%c0_51, %c112], %145 {strides = array<i32>} : memref<32x128xf32, #tpu.memory_space<vmem>>, vector<16x16xf32>,
    %147 = vector.extract_strided_slice %2 {offsets = [16, 0], sizes = [16, 16], strides = [1, 1]} : vector<32x384xf32> to vector<16x16xf32>
    %cst_52 = arith.constant 2.500000e-01 : f32
    %148 = vector.broadcast %cst_52 : f32 to vector<16x16xf32>
    %149 = arith.mulf %147, %148 : vector<16x16xf32>
    %150 = vector.extract_strided_slice %2 {offsets = [16, 128], sizes = [16, 16], strides = [1, 1]} : vector<32x384xf32> to vector<16x16xf32>
    %151 = vector.extract_strided_slice %2 {offsets = [16, 256], sizes = [16, 16], strides = [1, 1]} : vector<32x384xf32> to vector<16x16xf32>
    %cst_53 = arith.constant dense<0.000000e+00> : vector<16x16xf32>
    %152 = tpu.matmul %149, %150, %cst_53 {dimension_numbers = #tpu.dot_dimension_numbers<[1], [1], [0], [0], [0, 0, 1, 0], [], []>} : vector<16x16xf32>, vector<16x16xf32>, vector<16x16xf32> -> vector<16x16xf32>
    %cst_54 = arith.constant dense<0xFF800000> : vector<16xf32>
    %153 = vector.multi_reduction <maximumf>, %152, %cst_54 [1] : vector<16x16xf32> to vector<16xf32>
    %154 = vector.shape_cast %153 : vector<16xf32> to vector<16x1xf32>
    %155 = vector.broadcast %154 : vector<16x1xf32> to vector<16x16xf32>
    %156 = arith.subf %152, %155 : vector<16x16xf32>
    %157 = math.exp %156 : vector<16x16xf32>
    %cst_55 = arith.constant dense<0.000000e+00> : vector<16xf32>
    %158 = vector.multi_reduction <add>, %157, %cst_55 [1] : vector<16x16xf32> to vector<16xf32>
    %159 = vector.shape_cast %158 : vector<16xf32> to vector<16x1xf32>
    %160 = tpu.reciprocal %159 {approx = true} : vector<16x1xf32> -> vector<16x1xf32>
    %161 = vector.broadcast %160 : vector<16x1xf32> to vector<16x16xf32>
    %162 = arith.mulf %157, %161 : vector<16x16xf32>
    %cst_56 = arith.constant dense<0.000000e+00> : vector<16x16xf32>
    %163 = tpu.matmul %162, %151, %cst_56 {dimension_numbers = #tpu.dot_dimension_numbers<[1], [0], [0], [1], [0, 0, 1, 1], [], []>} : vector<16x16xf32>, vector<16x16xf32>, vector<16x16xf32> -> vector<16x16xf32>
    %c16_57 = arith.constant 16 : index
    %c0_58 = arith.constant 0 : index
    %164 = vector.load %arg6[%c16_57, %c0_58] : memref<32x128xf32, #tpu.memory_space<vmem>>, vector<16x16xf32>
    tpu.vector_store %arg6[%c16_57, %c0_58], %163 {strides = array<i32>} : memref<32x128xf32, #tpu.memory_space<vmem>>, vector<16x16xf32>,
    %165 = vector.extract_strided_slice %2 {offsets = [16, 16], sizes = [16, 16], strides = [1, 1]} : vector<32x384xf32> to vector<16x16xf32>
    %cst_59 = arith.constant 2.500000e-01 : f32
    %166 = vector.broadcast %cst_59 : f32 to vector<16x16xf32>
    %167 = arith.mulf %165, %166 : vector<16x16xf32>
    %168 = vector.extract_strided_slice %2 {offsets = [16, 144], sizes = [16, 16], strides = [1, 1]} : vector<32x384xf32> to vector<16x16xf32>
    %169 = vector.extract_strided_slice %2 {offsets = [16, 272], sizes = [16, 16], strides = [1, 1]} : vector<32x384xf32> to vector<16x16xf32>
    %cst_60 = arith.constant dense<0.000000e+00> : vector<16x16xf32>
    %170 = tpu.matmul %167, %168, %cst_60 {dimension_numbers = #tpu.dot_dimension_numbers<[1], [1], [0], [0], [0, 0, 1, 0], [], []>} : vector<16x16xf32>, vector<16x16xf32>, vector<16x16xf32> -> vector<16x16xf32>
    %cst_61 = arith.constant dense<0xFF800000> : vector<16xf32>
    %171 = vector.multi_reduction <maximumf>, %170, %cst_61 [1] : vector<16x16xf32> to vector<16xf32>
    %172 = vector.shape_cast %171 : vector<16xf32> to vector<16x1xf32>
    %173 = vector.broadcast %172 : vector<16x1xf32> to vector<16x16xf32>
    %174 = arith.subf %170, %173 : vector<16x16xf32>
    %175 = math.exp %174 : vector<16x16xf32>
    %cst_62 = arith.constant dense<0.000000e+00> : vector<16xf32>
    %176 = vector.multi_reduction <add>, %175, %cst_62 [1] : vector<16x16xf32> to vector<16xf32>
    %177 = vector.shape_cast %176 : vector<16xf32> to vector<16x1xf32>
    %178 = tpu.reciprocal %177 {approx = true} : vector<16x1xf32> -> vector<16x1xf32>
    %179 = vector.broadcast %178 : vector<16x1xf32> to vector<16x16xf32>
    %180 = arith.mulf %175, %179 : vector<16x16xf32>
    %cst_63 = arith.constant dense<0.000000e+00> : vector<16x16xf32>
    %181 = tpu.matmul %180, %169, %cst_63 {dimension_numbers = #tpu.dot_dimension_numbers<[1], [0], [0], [1], [0, 0, 1, 1], [], []>} : vector<16x16xf32>, vector<16x16xf32>, vector<16x16xf32> -> vector<16x16xf32>
    %c16_64 = arith.constant 16 : index
    %c16_65 = arith.constant 16 : index
    %182 = vector.load %arg6[%c16_64, %c16_65] : memref<32x128xf32, #tpu.memory_space<vmem>>, vector<16x16xf32>
    tpu.vector_store %arg6[%c16_64, %c16_65], %181 {strides = array<i32>} : memref<32x128xf32, #tpu.memory_space<vmem>>, vector<16x16xf32>,
    %183 = vector.extract_strided_slice %2 {offsets = [16, 32], sizes = [16, 16], strides = [1, 1]} : vector<32x384xf32> to vector<16x16xf32>
    %cst_66 = arith.constant 2.500000e-01 : f32
    %184 = vector.broadcast %cst_66 : f32 to vector<16x16xf32>
    %185 = arith.mulf %183, %184 : vector<16x16xf32>
    %186 = vector.extract_strided_slice %2 {offsets = [16, 160], sizes = [16, 16], strides = [1, 1]} : vector<32x384xf32> to vector<16x16xf32>
    %187 = vector.extract_strided_slice %2 {offsets = [16, 288], sizes = [16, 16], strides = [1, 1]} : vector<32x384xf32> to vector<16x16xf32>
    %cst_67 = arith.constant dense<0.000000e+00> : vector<16x16xf32>
    %188 = tpu.matmul %185, %186, %cst_67 {dimension_numbers = #tpu.dot_dimension_numbers<[1], [1], [0], [0], [0, 0, 1, 0], [], []>} : vector<16x16xf32>, vector<16x16xf32>, vector<16x16xf32> -> vector<16x16xf32>
    %cst_68 = arith.constant dense<0xFF800000> : vector<16xf32>
    %189 = vector.multi_reduction <maximumf>, %188, %cst_68 [1] : vector<16x16xf32> to vector<16xf32>
    %190 = vector.shape_cast %189 : vector<16xf32> to vector<16x1xf32>
    %191 = vector.broadcast %190 : vector<16x1xf32> to vector<16x16xf32>
    %192 = arith.subf %188, %191 : vector<16x16xf32>
    %193 = math.exp %192 : vector<16x16xf32>
    %cst_69 = arith.constant dense<0.000000e+00> : vector<16xf32>
    %194 = vector.multi_reduction <add>, %193, %cst_69 [1] : vector<16x16xf32> to vector<16xf32>
    %195 = vector.shape_cast %194 : vector<16xf32> to vector<16x1xf32>
    %196 = tpu.reciprocal %195 {approx = true} : vector<16x1xf32> -> vector<16x1xf32>
    %197 = vector.broadcast %196 : vector<16x1xf32> to vector<16x16xf32>
    %198 = arith.mulf %193, %197 : vector<16x16xf32>
    %cst_70 = arith.constant dense<0.000000e+00> : vector<16x16xf32>
    %199 = tpu.matmul %198, %187, %cst_70 {dimension_numbers = #tpu.dot_dimension_numbers<[1], [0], [0], [1], [0, 0, 1, 1], [], []>} : vector<16x16xf32>, vector<16x16xf32>, vector<16x16xf32> -> vector<16x16xf32>
    %c16_71 = arith.constant 16 : index
    %c32_72 = arith.constant 32 : index
    %200 = vector.load %arg6[%c16_71, %c32_72] : memref<32x128xf32, #tpu.memory_space<vmem>>, vector<16x16xf32>
    tpu.vector_store %arg6[%c16_71, %c32_72], %199 {strides = array<i32>} : memref<32x128xf32, #tpu.memory_space<vmem>>, vector<16x16xf32>,
    %201 = vector.extract_strided_slice %2 {offsets = [16, 48], sizes = [16, 16], strides = [1, 1]} : vector<32x384xf32> to vector<16x16xf32>
    %cst_73 = arith.constant 2.500000e-01 : f32
    %202 = vector.broadcast %cst_73 : f32 to vector<16x16xf32>
    %203 = arith.mulf %201, %202 : vector<16x16xf32>
    %204 = vector.extract_strided_slice %2 {offsets = [16, 176], sizes = [16, 16], strides = [1, 1]} : vector<32x384xf32> to vector<16x16xf32>
    %205 = vector.extract_strided_slice %2 {offsets = [16, 304], sizes = [16, 16], strides = [1, 1]} : vector<32x384xf32> to vector<16x16xf32>
    %cst_74 = arith.constant dense<0.000000e+00> : vector<16x16xf32>
    %206 = tpu.matmul %203, %204, %cst_74 {dimension_numbers = #tpu.dot_dimension_numbers<[1], [1], [0], [0], [0, 0, 1, 0], [], []>} : vector<16x16xf32>, vector<16x16xf32>, vector<16x16xf32> -> vector<16x16xf32>
    %cst_75 = arith.constant dense<0xFF800000> : vector<16xf32>
    %207 = vector.multi_reduction <maximumf>, %206, %cst_75 [1] : vector<16x16xf32> to vector<16xf32>
    %208 = vector.shape_cast %207 : vector<16xf32> to vector<16x1xf32>
    %209 = vector.broadcast %208 : vector<16x1xf32> to vector<16x16xf32>
    %210 = arith.subf %206, %209 : vector<16x16xf32>
    %211 = math.exp %210 : vector<16x16xf32>
    %cst_76 = arith.constant dense<0.000000e+00> : vector<16xf32>
    %212 = vector.multi_reduction <add>, %211, %cst_76 [1] : vector<16x16xf32> to vector<16xf32>
    %213 = vector.shape_cast %212 : vector<16xf32> to vector<16x1xf32>
    %214 = tpu.reciprocal %213 {approx = true} : vector<16x1xf32> -> vector<16x1xf32>
    %215 = vector.broadcast %214 : vector<16x1xf32> to vector<16x16xf32>
    %216 = arith.mulf %211, %215 : vector<16x16xf32>
    %cst_77 = arith.constant dense<0.000000e+00> : vector<16x16xf32>
    %217 = tpu.matmul %216, %205, %cst_77 {dimension_numbers = #tpu.dot_dimension_numbers<[1], [0], [0], [1], [0, 0, 1, 1], [], []>} : vector<16x16xf32>, vector<16x16xf32>, vector<16x16xf32> -> vector<16x16xf32>
    %c16_78 = arith.constant 16 : index
    %c48_79 = arith.constant 48 : index
    %218 = vector.load %arg6[%c16_78, %c48_79] : memref<32x128xf32, #tpu.memory_space<vmem>>, vector<16x16xf32>
    tpu.vector_store %arg6[%c16_78, %c48_79], %217 {strides = array<i32>} : memref<32x128xf32, #tpu.memory_space<vmem>>, vector<16x16xf32>,
    %219 = vector.extract_strided_slice %2 {offsets = [16, 64], sizes = [16, 16], strides = [1, 1]} : vector<32x384xf32> to vector<16x16xf32>
    %cst_80 = arith.constant 2.500000e-01 : f32
    %220 = vector.broadcast %cst_80 : f32 to vector<16x16xf32>
    %221 = arith.mulf %219, %220 : vector<16x16xf32>
    %222 = vector.extract_strided_slice %2 {offsets = [16, 192], sizes = [16, 16], strides = [1, 1]} : vector<32x384xf32> to vector<16x16xf32>
    %223 = vector.extract_strided_slice %2 {offsets = [16, 320], sizes = [16, 16], strides = [1, 1]} : vector<32x384xf32> to vector<16x16xf32>
    %cst_81 = arith.constant dense<0.000000e+00> : vector<16x16xf32>
    %224 = tpu.matmul %221, %222, %cst_81 {dimension_numbers = #tpu.dot_dimension_numbers<[1], [1], [0], [0], [0, 0, 1, 0], [], []>} : vector<16x16xf32>, vector<16x16xf32>, vector<16x16xf32> -> vector<16x16xf32>
    %cst_82 = arith.constant dense<0xFF800000> : vector<16xf32>
    %225 = vector.multi_reduction <maximumf>, %224, %cst_82 [1] : vector<16x16xf32> to vector<16xf32>
    %226 = vector.shape_cast %225 : vector<16xf32> to vector<16x1xf32>
    %227 = vector.broadcast %226 : vector<16x1xf32> to vector<16x16xf32>
    %228 = arith.subf %224, %227 : vector<16x16xf32>
    %229 = math.exp %228 : vector<16x16xf32>
    %cst_83 = arith.constant dense<0.000000e+00> : vector<16xf32>
    %230 = vector.multi_reduction <add>, %229, %cst_83 [1] : vector<16x16xf32> to vector<16xf32>
    %231 = vector.shape_cast %230 : vector<16xf32> to vector<16x1xf32>
    %232 = tpu.reciprocal %231 {approx = true} : vector<16x1xf32> -> vector<16x1xf32>
    %233 = vector.broadcast %232 : vector<16x1xf32> to vector<16x16xf32>
    %234 = arith.mulf %229, %233 : vector<16x16xf32>
    %cst_84 = arith.constant dense<0.000000e+00> : vector<16x16xf32>
    %235 = tpu.matmul %234, %223, %cst_84 {dimension_numbers = #tpu.dot_dimension_numbers<[1], [0], [0], [1], [0, 0, 1, 1], [], []>} : vector<16x16xf32>, vector<16x16xf32>, vector<16x16xf32> -> vector<16x16xf32>
    %c16_85 = arith.constant 16 : index
    %c64_86 = arith.constant 64 : index
    %236 = vector.load %arg6[%c16_85, %c64_86] : memref<32x128xf32, #tpu.memory_space<vmem>>, vector<16x16xf32>
    tpu.vector_store %arg6[%c16_85, %c64_86], %235 {strides = array<i32>} : memref<32x128xf32, #tpu.memory_space<vmem>>, vector<16x16xf32>,
    %237 = vector.extract_strided_slice %2 {offsets = [16, 80], sizes = [16, 16], strides = [1, 1]} : vector<32x384xf32> to vector<16x16xf32>
    %cst_87 = arith.constant 2.500000e-01 : f32
    %238 = vector.broadcast %cst_87 : f32 to vector<16x16xf32>
    %239 = arith.mulf %237, %238 : vector<16x16xf32>
    %240 = vector.extract_strided_slice %2 {offsets = [16, 208], sizes = [16, 16], strides = [1, 1]} : vector<32x384xf32> to vector<16x16xf32>
    %241 = vector.extract_strided_slice %2 {offsets = [16, 336], sizes = [16, 16], strides = [1, 1]} : vector<32x384xf32> to vector<16x16xf32>
    %cst_88 = arith.constant dense<0.000000e+00> : vector<16x16xf32>
    %242 = tpu.matmul %239, %240, %cst_88 {dimension_numbers = #tpu.dot_dimension_numbers<[1], [1], [0], [0], [0, 0, 1, 0], [], []>} : vector<16x16xf32>, vector<16x16xf32>, vector<16x16xf32> -> vector<16x16xf32>
    %cst_89 = arith.constant dense<0xFF800000> : vector<16xf32>
    %243 = vector.multi_reduction <maximumf>, %242, %cst_89 [1] : vector<16x16xf32> to vector<16xf32>
    %244 = vector.shape_cast %243 : vector<16xf32> to vector<16x1xf32>
    %245 = vector.broadcast %244 : vector<16x1xf32> to vector<16x16xf32>
    %246 = arith.subf %242, %245 : vector<16x16xf32>
    %247 = math.exp %246 : vector<16x16xf32>
    %cst_90 = arith.constant dense<0.000000e+00> : vector<16xf32>
    %248 = vector.multi_reduction <add>, %247, %cst_90 [1] : vector<16x16xf32> to vector<16xf32>
    %249 = vector.shape_cast %248 : vector<16xf32> to vector<16x1xf32>
    %250 = tpu.reciprocal %249 {approx = true} : vector<16x1xf32> -> vector<16x1xf32>
    %251 = vector.broadcast %250 : vector<16x1xf32> to vector<16x16xf32>
    %252 = arith.mulf %247, %251 : vector<16x16xf32>
    %cst_91 = arith.constant dense<0.000000e+00> : vector<16x16xf32>
    %253 = tpu.matmul %252, %241, %cst_91 {dimension_numbers = #tpu.dot_dimension_numbers<[1], [0], [0], [1], [0, 0, 1, 1], [], []>} : vector<16x16xf32>, vector<16x16xf32>, vector<16x16xf32> -> vector<16x16xf32>
    %c16_92 = arith.constant 16 : index
    %c80_93 = arith.constant 80 : index
    %254 = vector.load %arg6[%c16_92, %c80_93] : memref<32x128xf32, #tpu.memory_space<vmem>>, vector<16x16xf32>
    tpu.vector_store %arg6[%c16_92, %c80_93], %253 {strides = array<i32>} : memref<32x128xf32, #tpu.memory_space<vmem>>, vector<16x16xf32>,
    %255 = vector.extract_strided_slice %2 {offsets = [16, 96], sizes = [16, 16], strides = [1, 1]} : vector<32x384xf32> to vector<16x16xf32>
    %cst_94 = arith.constant 2.500000e-01 : f32
    %256 = vector.broadcast %cst_94 : f32 to vector<16x16xf32>
    %257 = arith.mulf %255, %256 : vector<16x16xf32>
    %258 = vector.extract_strided_slice %2 {offsets = [16, 224], sizes = [16, 16], strides = [1, 1]} : vector<32x384xf32> to vector<16x16xf32>
    %259 = vector.extract_strided_slice %2 {offsets = [16, 352], sizes = [16, 16], strides = [1, 1]} : vector<32x384xf32> to vector<16x16xf32>
    %cst_95 = arith.constant dense<0.000000e+00> : vector<16x16xf32>
    %260 = tpu.matmul %257, %258, %cst_95 {dimension_numbers = #tpu.dot_dimension_numbers<[1], [1], [0], [0], [0, 0, 1, 0], [], []>} : vector<16x16xf32>, vector<16x16xf32>, vector<16x16xf32> -> vector<16x16xf32>
    %cst_96 = arith.constant dense<0xFF800000> : vector<16xf32>
    %261 = vector.multi_reduction <maximumf>, %260, %cst_96 [1] : vector<16x16xf32> to vector<16xf32>
    %262 = vector.shape_cast %261 : vector<16xf32> to vector<16x1xf32>
    %263 = vector.broadcast %262 : vector<16x1xf32> to vector<16x16xf32>
    %264 = arith.subf %260, %263 : vector<16x16xf32>
    %265 = math.exp %264 : vector<16x16xf32>
    %cst_97 = arith.constant dense<0.000000e+00> : vector<16xf32>
    %266 = vector.multi_reduction <add>, %265, %cst_97 [1] : vector<16x16xf32> to vector<16xf32>
    %267 = vector.shape_cast %266 : vector<16xf32> to vector<16x1xf32>
    %268 = tpu.reciprocal %267 {approx = true} : vector<16x1xf32> -> vector<16x1xf32>
    %269 = vector.broadcast %268 : vector<16x1xf32> to vector<16x16xf32>
    %270 = arith.mulf %265, %269 : vector<16x16xf32>
    %cst_98 = arith.constant dense<0.000000e+00> : vector<16x16xf32>
    %271 = tpu.matmul %270, %259, %cst_98 {dimension_numbers = #tpu.dot_dimension_numbers<[1], [0], [0], [1], [0, 0, 1, 1], [], []>} : vector<16x16xf32>, vector<16x16xf32>, vector<16x16xf32> -> vector<16x16xf32>
    %c16_99 = arith.constant 16 : index
    %c96_100 = arith.constant 96 : index
    %272 = vector.load %arg6[%c16_99, %c96_100] : memref<32x128xf32, #tpu.memory_space<vmem>>, vector<16x16xf32>
    tpu.vector_store %arg6[%c16_99, %c96_100], %271 {strides = array<i32>} : memref<32x128xf32, #tpu.memory_space<vmem>>, vector<16x16xf32>,
    %273 = vector.extract_strided_slice %2 {offsets = [16, 112], sizes = [16, 16], strides = [1, 1]} : vector<32x384xf32> to vector<16x16xf32>
    %cst_101 = arith.constant 2.500000e-01 : f32
    %274 = vector.broadcast %cst_101 : f32 to vector<16x16xf32>
    %275 = arith.mulf %273, %274 : vector<16x16xf32>
    %276 = vector.extract_strided_slice %2 {offsets = [16, 240], sizes = [16, 16], strides = [1, 1]} : vector<32x384xf32> to vector<16x16xf32>
    %277 = vector.extract_strided_slice %2 {offsets = [16, 368], sizes = [16, 16], strides = [1, 1]} : vector<32x384xf32> to vector<16x16xf32>
    %cst_102 = arith.constant dense<0.000000e+00> : vector<16x16xf32>
    %278 = tpu.matmul %275, %276, %cst_102 {dimension_numbers = #tpu.dot_dimension_numbers<[1], [1], [0], [0], [0, 0, 1, 0], [], []>} : vector<16x16xf32>, vector<16x16xf32>, vector<16x16xf32> -> vector<16x16xf32>
    %cst_103 = arith.constant dense<0xFF800000> : vector<16xf32>
    %279 = vector.multi_reduction <maximumf>, %278, %cst_103 [1] : vector<16x16xf32> to vector<16xf32>
    %280 = vector.shape_cast %279 : vector<16xf32> to vector<16x1xf32>
    %281 = vector.broadcast %280 : vector<16x1xf32> to vector<16x16xf32>
    %282 = arith.subf %278, %281 : vector<16x16xf32>
    %283 = math.exp %282 : vector<16x16xf32>
    %cst_104 = arith.constant dense<0.000000e+00> : vector<16xf32>
    %284 = vector.multi_reduction <add>, %283, %cst_104 [1] : vector<16x16xf32> to vector<16xf32>
    %285 = vector.shape_cast %284 : vector<16xf32> to vector<16x1xf32>
    %286 = tpu.reciprocal %285 {approx = true} : vector<16x1xf32> -> vector<16x1xf32>
    %287 = vector.broadcast %286 : vector<16x1xf32> to vector<16x16xf32>
    %288 = arith.mulf %283, %287 : vector<16x16xf32>
    %cst_105 = arith.constant dense<0.000000e+00> : vector<16x16xf32>
    %289 = tpu.matmul %288, %277, %cst_105 {dimension_numbers = #tpu.dot_dimension_numbers<[1], [0], [0], [1], [0, 0, 1, 1], [], []>} : vector<16x16xf32>, vector<16x16xf32>, vector<16x16xf32> -> vector<16x16xf32>
    %c16_106 = arith.constant 16 : index
    %c112_107 = arith.constant 112 : index
    %290 = vector.load %arg6[%c16_106, %c112_107] : memref<32x128xf32, #tpu.memory_space<vmem>>, vector<16x16xf32>
    tpu.vector_store %arg6[%c16_106, %c112_107], %289 {strides = array<i32>} : memref<32x128xf32, #tpu.memory_space<vmem>>, vector<16x16xf32>,
    %c0_108 = arith.constant 0 : index
    %c0_109 = arith.constant 0 : index
    %291 = vector.load %arg6[%c0_108, %c0_109] : memref<32x128xf32, #tpu.memory_space<vmem>>, vector<32x128xf32>
    %c0_110 = arith.constant 0 : index
    %c0_111 = arith.constant 0 : index
    %292 = vector.load %arg3[%c0_110, %c0_111] : memref<128x128xf32, #tpu.memory_space<vmem>>, vector<128x128xf32>
    %cst_112 = arith.constant dense<0.000000e+00> : vector<32x128xf32>
    %293 = tpu.matmul %291, %292, %cst_112 {dimension_numbers = #tpu.dot_dimension_numbers<[1], [0], [0], [1], [0, 0, 1, 1], [], []>} : vector<32x128xf32>, vector<128x128xf32>, vector<32x128xf32> -> vector<32x128xf32>
    %c0_113 = arith.constant 0 : index
    %c0_114 = arith.constant 0 : index
    %294 = vector.load %arg4[%c0_113, %c0_114] : memref<1x128xf32, #tpu.memory_space<vmem>>, vector<1x128xf32>
    %295 = vector.broadcast %294 : vector<1x128xf32> to vector<32x128xf32>
    %296 = arith.addf %293, %295 : vector<32x128xf32>
    %c0_115 = arith.constant 0 : index
    %c0_116 = arith.constant 0 : index
    %297 = vector.load %arg5[%c0_115, %c0_116] : memref<32x128xf32, #tpu.memory_space<vmem>>, vector<32x128xf32>
    tpu.vector_store %arg5[%c0_115, %c0_116], %296 {strides = array<i32>} : memref<32x128xf32, #tpu.memory_space<vmem>>, vector<32x128xf32>,
    return
  }
  func.func @transform_0(%arg0: i32) -> (i32, i32) {
    %c0_i32 = arith.constant 0 : i32
    %c0_i32_0 = arith.constant 0 : i32
    return %arg0, %c0_i32 : i32, i32
  }
  func.func @transform_1(%arg0: i32) -> (i32, i32) {
    %c0_i32 = arith.constant 0 : i32
    %c0_i32_0 = arith.constant 0 : i32
    %c0_i32_1 = arith.constant 0 : i32
    return %c0_i32, %c0_i32_0 : i32, i32
  }
  func.func @transform_2(%arg0: i32) -> (i32, i32) {
    %c0_i32 = arith.constant 0 : i32
    %c0_i32_0 = arith.constant 0 : i32
    %c0_i32_1 = arith.constant 0 : i32
    return %c0_i32, %c0_i32_0 : i32, i32
  }
  func.func @transform_3(%arg0: i32) -> (i32, i32) {
    %c0_i32 = arith.constant 0 : i32
    %c0_i32_0 = arith.constant 0 : i32
    %c0_i32_1 = arith.constant 0 : i32
    return %c0_i32, %c0_i32_0 : i32, i32
  }
  func.func @transform_4(%arg0: i32) -> (i32, i32) {
    %c0_i32 = arith.constant 0 : i32
    %c0_i32_0 = arith.constant 0 : i32
    return %arg0, %c0_i32 : i32, i32
  }
}

</mosaic_0001>

<bundles_post_ra>
// kernel: tpu_custom_call.1
= control target key start
LH: loop header
LB: loop body
LE: loop exit
PB: predicated region body
PF: predicated region fallthrough
CT: control target
= control target key end

     0   :  { %9 = vsyncpa [#allocation4], 0  ;;  %s5554_s0 = inlined_call_operand.hbm [shape: f32[32,128], index: 0, kind: input, shape index: {}]   ;;  %s5555_s1 = inlined_call_operand.hbm [shape: f32[128,384], index: 1, kind: input, shape index: {}]   ;;  %s5556_s2 = inlined_call_operand.hbm [shape: f32[128,128], index: 2, kind: input, shape index: {}]   ;;  %s5557_s3 = inlined_call_operand.vmem [shape: f32[1,128], index: 3, kind: input, shape index: {}]   ;;  %s5558_s4 = inlined_call_operand.hbm [shape: f32[32,128], index: 4, kind: output, shape index: {}]  }
   0x1   :  { %10 = vsyncpa [#allocation7], 0 }
   0x2   :  { %11 = vsyncpa [#allocation5], 0  ;;  %s4958_s15 = smov [#allocation6]   ;;  %s4864_s19 = scalar_lea.hbm %s5555_s1, 6144 }
   0x3   :  { %s29_s16 = sshll.u32 %s4958_s15, 4  ;;  %p4865_p0 = scmp.ne.s32.totalorder %s5555_s1, %s4864_s19  ;;  %s30_s16 = int_to_ptr.vmem [resolvable:$true] %s29_s16 }
   0x4   :  { %p4868_p1 = scmp.lt.u32.totalorder %s4864_s19, %s5555_s1 }
   0x6   :  { %p4870_p2 = pnand %p4868_p1, %p4865_p0 }
   0x8   :  { %4873 = shalt.err (!%p4870_p2)
}
   0x9   :  { %s4874_s24 = scalar_lea.vmem %s30_s16, 6144  ;;  %p4879_p4 = scmp.lt.s32.totalorder %s30_s16, %s30_s16 }
   0xa   :  { %p4875_p3 = scmp.ne.s32.totalorder %s30_s16, %s4874_s24  ;;  %p4880_p5 = scmp.lt.s32.totalorder %s4874_s24, %s4874_s24 }
   0xc   :  { %p4881_p6 = por %p4880_p5, %p4879_p4 }
   0xe   :  { %p4882_p7 = pnand %p4881_p6, %p4875_p3 }
  0x10   :  { %4885 = shalt.err (!%p4882_p7)
}
  0x11   :  { %s4959_s25 = smov 384   ;;  %s4960_s26 = smov 24  }
  0x12   :  { %35 = dma.hbm_to_vmem [thread:$0]  %s5555_s1, 6144, %s30_s16, [#allocation7], %s4959_s25, %s4959_s25, %s4960_s26  }
  0x13   :  { %s4961_s29 = smov [#allocation3]   ;;  %s4886_s7 = scalar_lea.hbm %s5554_s0, 512 }
  0x14   :  { %s17_s30 = sshll.u32 %s4961_s29, 4  ;;  %p4887_p8 = scmp.ne.s32.totalorder %s5554_s0, %s4886_s7  ;;  %s18_s30 = int_to_ptr.vmem [resolvable:$true] %s17_s30 }
  0x15   :  { %p4890_p9 = scmp.lt.u32.totalorder %s4886_s7, %s5554_s0 }
  0x17   :  { %p4892_p10 = pnand %p4890_p9, %p4887_p8 }
  0x19   :  { %4895 = shalt.err (!%p4892_p10)
}
  0x1a   :  { %s4896_s12 = scalar_lea.vmem %s18_s30, 512  ;;  %p4901_p12 = scmp.lt.s32.totalorder %s18_s30, %s18_s30 }
  0x1b   :  { %p4897_p11 = scmp.ne.s32.totalorder %s18_s30, %s4896_s12  ;;  %p4902_p13 = scmp.lt.s32.totalorder %s4896_s12, %s4896_s12 }
  0x1d   :  { %p4903_p0 = por %p4902_p13, %p4901_p12 }
  0x1f   :  { %p4904_p1 = pnand %p4903_p0, %p4897_p11 }
  0x21   :  { %4907 = shalt.err (!%p4904_p1)
}
  0x22   :  { %s4962_s1 = smov 128   ;;  %s4963_s13 = smov 8  }
  0x23   :  { %23 = dma.hbm_to_vmem [thread:$0]  %s5554_s0, 512, %s18_s30, [#allocation4], %s4962_s1, %s4962_s1, %s4963_s13  }
  0x24   :  { %s4964_s16 = smov [#allocation8]   ;;  %s4908_s20 = scalar_lea.hbm %s5556_s2, 2048 }
  0x25   :  { %s41_s17 = sshll.u32 %s4964_s16, 4  ;;  %p4909_p2 = scmp.ne.s32.totalorder %s5556_s2, %s4908_s20  ;;  %s42_s17 = int_to_ptr.vmem [resolvable:$true] %s41_s17 }
  0x26   :  { %p4912_p3 = scmp.lt.u32.totalorder %s4908_s20, %s5556_s2 }
  0x28   :  { %p4914_p4 = pnand %p4912_p3, %p4909_p2 }
  0x2a   :  { %4917 = shalt.err (!%p4914_p4)
}
  0x2b   :  { %s4918_s25 = scalar_lea.vmem %s42_s17, 2048  ;;  %p4923_p6 = scmp.lt.s32.totalorder %s42_s17, %s42_s17 }
  0x2c   :  { %p4919_p5 = scmp.ne.s32.totalorder %s42_s17, %s4918_s25  ;;  %p4924_p7 = scmp.lt.s32.totalorder %s4918_s25, %s4918_s25 }
  0x2e   :  { %p4925_p8 = por %p4924_p7, %p4923_p6 }
  0x30   :  { %p4926_p9 = pnand %p4925_p8, %p4919_p5 }
  0x32   :  { %4929 = shalt.err (!%p4926_p9)
}
  0x33   :  { %47 = dma.hbm_to_vmem [thread:$0]  %s5556_s2, 2048, %s42_s17, [#allocation7], %s4962_s1, %s4962_s1, %s4963_s13  }
  0x34   :  { %4952 = dma.done.wait [#allocation4], 512  }
  0x35   :  { %4953 = vsyncadd [#allocation4], 4294966784 }
  0x36   :  { %4954 = dma.done.wait [#allocation7], 8192  }
  0x37   :  { %4955 = vsyncadd [#allocation7], 4294959104  ;;  %v4965_v0 = vmov 0.0   ;;  %v64_v1 = vld [vmem:[#allocation6 + $0x8] sm:$0xff]  ;;  %v67_v2 = vld [vmem:[#allocation6 + $0x20] sm:$0xff]  ;;  %vm287_vm0 = vcmask 130048  }
  0x38   :  { %175 = vmatprep.mubr.f32.mxu0 %v4965_v0  ;;  %v63_v3 = vld [vmem:[#allocation6] sm:$0xff]  ;;  %v4324_v4 = vpack.c.bf16 %v67_v2, %v64_v1  ;;  %v66_v5 = vld [vmem:[#allocation6 + $0x18] sm:$0xff]  ;;  %v73_v7 = vld [vmem:[#allocation6 + $0x50] sm:$0xff]  ;;  %s4966_s2 = smov 112   ;;  %s4967_s27 = smov 96   ;;  %vm690_vm2 = vcmask 261248  }
  0x39   :  { %v70_v6 = vld [vmem:[#allocation6 + $0x38] sm:$0xff]  ;;  %v4326_v8 = vpack.c.bf16 %v66_v5, %v63_v3  ;;  %v69_v10 = vld [vmem:[#allocation6 + $0x30] sm:$0xff]  ;;  %v72_v11 = vld [vmem:[#allocation6 + $0x48] sm:$0xff]  ;;  %s4968_s28 = smov 80   ;;  %s4969_s29 = smov 64   ;;  %vm901_vm3 = vcmask 392448  }
  0x3a   :  { %v4328_v9 = vpack.c.bf16 %v73_v7, %v70_v6  ;;  %v76_v12 = vld [vmem:[#allocation6 + $0x68] sm:$0xff]  ;;  %4325 = vmatprep.subr.bf16.mxu0 %v4324_v4  ;;  %v79_v13 = vld [vmem:[#allocation6 + $0x80] sm:$0xff]  ;;  %v4330_v14 = vpack.c.bf16 %v72_v11, %v69_v10  ;;  %v78_v17 = vld [vmem:[#allocation6 + $0x78] sm:$0xff]  ;;  %s4970_s30 = smov 48   ;;  %s4971_s5 = smov 32   ;;  %vm1112_vm4 = vcmask 523648  }
  0x3b   :  { %4327 = vmatpush1.bf16.msra.mxu0 %v4326_v8  ;;  %v4332_v15 = vpack.c.bf16 %v79_v13, %v76_v12  ;;  %v75_v16 = vld [vmem:[#allocation6 + $0x60] sm:$0xff]  ;;  %v82_v18 = vld [vmem:[#allocation6 + $0x98] sm:$0xff]  ;;  %v85_v19 = vld [vmem:[#allocation6 + $0xb0] sm:$0xff]  ;;  %s4972_s6 = smov 16   ;;  %vm1323_vm5 = vcmask 654848   ;;  %vm1534_vm6 = vcmask 786048  }
  0x3c   :  { %4329 = vmatprep.subr.bf16.mxu0 %v4328_v9  ;;  %v4334_v20 = vpack.c.bf16 %v78_v17, %v75_v16  ;;  %v4336_v21 = vpack.c.bf16 %v85_v19, %v82_v18  ;;  %v81_v22 = vld [vmem:[#allocation6 + $0x90] sm:$0xff]  ;;  %v84_v23 = vld [vmem:[#allocation6 + $0xa8] sm:$0xff]  ;;  %v91_v25 = vld [vmem:[#allocation6 + $0xe0] sm:$0xff]  ;;  %vm1745_vm7 = vcmask 917248   ;;  %vm1956_vm8 = vcmask 1048448   ;;  %s4973_s9 = smov [#allocation9]  }
  0x3d   :  { %v88_v24 = vld [vmem:[#allocation6 + $0xc8] sm:$0xff]  ;;  %v5042_v26 = vld [vmem:[#allocation3] sm:$0xff]  ;;  %v65_v27 = vld [vmem:[#allocation6 + $0x10] sm:$0xff]  ;;  %v4338_v29 = vpack.c.bf16 %v84_v23, %v81_v22  ;;  %s3746_s10 = sshll.u32 %s4973_s9, 4  ;;  %s3747_s10 = int_to_ptr.vmem [resolvable:$true] %s3746_s10 }
  0x3e   :  { %v68_v28 = vld [vmem:[#allocation6 + $0x28] sm:$0xff]  ;;  %4056 = vmatprep.mubr.f32.mxu1 %v5042_v26  ;;  %v87_v30 = vld [vmem:[#allocation6 + $0xc0] sm:$0xff]  ;;  %v74_v33 = vld [vmem:[#allocation6 + $0x58] sm:$0xff]  ;;  %v4340_v34 = vpack.c.bf16 %v91_v25, %v88_v24  ;;  %p4935_p11 = scmp.lt.s32.totalorder %s3747_s10, %s3747_s10 }
  0x3f   :  { %4331 = vmatpush1.bf16.msra.mxu0 %v4330_v14  ;;  %v4356_v31 = vpack.c.bf16 %v68_v28, %v65_v27  ;;  %v71_v32 = vld [vmem:[#allocation6 + $0x40] sm:$0xff]  ;;  %v90_v35 = vld [vmem:[#allocation6 + $0xd8] sm:$0xff]  ;;  %v77_v37 = vld [vmem:[#allocation6 + $0x70] sm:$0xff] }
  0x40   :  { %4333 = vmatprep.subr.bf16.mxu0 %v4332_v15  ;;  %v4360_v36 = vpack.c.bf16 %v74_v33, %v71_v32  ;;  %v80_v38 = vld [vmem:[#allocation6 + $0x88] sm:$0xff]  ;;  %v94_v39 = vld [vmem:[#allocation6 + $0xf8] sm:$0xff]  ;;  %v97_v40 = vld [vmem:[#allocation6 + $0x110] sm:$0xff]  ;;  %v4342_v41 = vpack.c.bf16 %v90_v35, %v87_v30 }
  0x41   :  { %4357 = vmatprep.subr.bf16.mxu1 %v4356_v31  ;;  %v93_v42 = vld [vmem:[#allocation6 + $0xf0] sm:$0xff]  ;;  %v4364_v43 = vpack.c.bf16 %v80_v38, %v77_v37  ;;  %v4344_v44 = vpack.c.bf16 %v97_v40, %v94_v39  ;;  %v96_v45 = vld [vmem:[#allocation6 + $0x108] sm:$0xff]  ;;  %v83_v46 = vld [vmem:[#allocation6 + $0xa0] sm:$0xff] }
  0x42   :  { %4359 = vmatpush3.bf16.msra.mxu1 %v4356_v31  ;;  %v86_v47 = vld [vmem:[#allocation6 + $0xb8] sm:$0xff]  ;;  %v100_v48 = vld [vmem:[#allocation6 + $0x128] sm:$0xff]  ;;  %v103_v49 = vld [vmem:[#allocation6 + $0x140] sm:$0xff]  ;;  %v4346_v50 = vpack.c.bf16 %v96_v45, %v93_v42 }
  0x43   :  { %4335 = vmatpush1.bf16.msra.mxu0 %v4334_v20  ;;  %4361 = vmatprep.subr.bf16.mxu1 %v4360_v36  ;;  %v99_v51 = vld [vmem:[#allocation6 + $0x120] sm:$0xff]  ;;  %v4368_v52 = vpack.c.bf16 %v86_v47, %v83_v46  ;;  %v4348_v53 = vpack.c.bf16 %v103_v49, %v100_v48  ;;  %v102_v54 = vld [vmem:[#allocation6 + $0x138] sm:$0xff]  ;;  %v89_v55 = vld [vmem:[#allocation6 + $0xd0] sm:$0xff] }
  0x44   :  { %4337 = vmatprep.subr.bf16.mxu0 %v4336_v21  ;;  %v92_v56 = vld [vmem:[#allocation6 + $0xe8] sm:$0xff]  ;;  %v106_v57 = vld [vmem:[#allocation6 + $0x158] sm:$0xff]  ;;  %v109_v58 = vld [vmem:[#allocation6 + $0x170] sm:$0xff]  ;;  %v4350_v59 = vpack.c.bf16 %v102_v54, %v99_v51 }
  0x45   :  { %v105_v60 = vld [vmem:[#allocation6 + $0x150] sm:$0xff]  ;;  %v4372_v61 = vpack.c.bf16 %v92_v56, %v89_v55  ;;  %v4352_v62 = vpack.c.bf16 %v109_v58, %v106_v57  ;;  %v108_v63 = vld [vmem:[#allocation6 + $0x168] sm:$0xff]  ;;  %v95_v1 = vld [vmem:[#allocation6 + $0x100] sm:$0xff] }
  0x46   :  { %4363 = vmatpush3.bf16.msra.mxu1 %v4360_v36  ;;  %v98_v2 = vld [vmem:[#allocation6 + $0x118] sm:$0xff]  ;;  %v4354_v3 = vpack.c.bf16 %v108_v63, %v105_v60  ;;  %v101_v5 = vld [vmem:[#allocation6 + $0x130] sm:$0xff]  ;;  %v104_v6 = vld [vmem:[#allocation6 + $0x148] sm:$0xff] }
  0x47   :  { %4339 = vmatpush1.bf16.msra.mxu0 %v4338_v29  ;;  %4365 = vmatprep.subr.bf16.mxu1 %v4364_v43  ;;  %v4376_v4 = vpack.c.bf16 %v98_v2, %v95_v1  ;;  %v4380_v7 = vpack.c.bf16 %v104_v6, %v101_v5  ;;  %v107_v8 = vld [vmem:[#allocation6 + $0x160] sm:$0xff]  ;;  %v110_v9 = vld [vmem:[#allocation6 + $0x178] sm:$0xff]  ;;  %v60_v10 = vld [vmem:[#allocation3 + $0x8] sm:$0xff] }
  0x48   :  { %4341 = vmatprep.subr.bf16.mxu0 %v4340_v34  ;;  %v4384_v11 = vpack.c.bf16 %v110_v9, %v107_v8  ;;  %v61_v12 = vld [vmem:[#allocation3 + $0x10] sm:$0xff]  ;;  %v62_v13 = vld [vmem:[#allocation3 + $0x18] sm:$0xff]  ;;  %vm5057_vm1 = vmpackc.low %vm287_vm0, %vm287_vm0 }
  0x4a   :  { %4367 = vmatpush3.bf16.msra.mxu1 %v4364_v43 }
  0x4b   :  { %4343 = vmatpush1.bf16.msra.mxu0 %v4342_v41  ;;  %4369 = vmatprep.subr.bf16.mxu1 %v4368_v52 }
  0x4c   :  { %4345 = vmatprep.subr.bf16.mxu0 %v4344_v44 }
  0x4e   :  { %4371 = vmatpush3.bf16.msra.mxu1 %v4368_v52 }
  0x4f   :  { %4347 = vmatpush1.bf16.msra.mxu0 %v4346_v50  ;;  %4373 = vmatprep.subr.bf16.mxu1 %v4372_v61 }
  0x50   :  { %4349 = vmatprep.subr.bf16.mxu0 %v4348_v53 }
  0x52   :  { %4375 = vmatpush3.bf16.msra.mxu1 %v4372_v61 }
  0x53   :  { %4351 = vmatpush1.bf16.msra.mxu0 %v4350_v59  ;;  %4377 = vmatprep.subr.bf16.mxu1 %v4376_v4 }
  0x54   :  { %4353 = vmatprep.subr.bf16.mxu0 %v4352_v62 }
  0x56   :  { %4379 = vmatpush3.bf16.msra.mxu1 %v4376_v4 }
  0x57   :  { %4355 = vmatpush1.bf16.msra.mxu0 %v4354_v3  ;;  %4381 = vmatprep.subr.bf16.mxu1 %v4380_v7 }
  0x5a   :  { %176 = vmatmul.mubr.f32.vlgmr.msra.gmra.mrb[0].mxu0 %v5042_v26  ;;  %4383 = vmatpush3.bf16.msra.mxu1 %v4380_v7 }
  0x5b   :  { %181 = vmatprep.mubr.f32.mxu0 %v4965_v0  ;;  %4385 = vmatprep.subr.bf16.mxu1 %v4384_v11 }
  0x5e   :  { %182 = vmatmul.mubr.f32.gmra.mrb[2].mxu0 %v60_v10  ;;  %4387 = vmatpush3.bf16.msra.mxu1 %v4384_v11 }
  0x5f   :  { %187 = vmatprep.mubr.f32.mxu0 %v4965_v0 }
  0x61   :  { %4057 = vmatmul.mubr.f32.vlgmr.msra.gmra.mrb[0].mxu1 %v60_v10 }
  0x62   :  { %4059 = vmatprep.mubr.f32.mxu1 %v61_v12  ;;  %188 = vmatmul.mubr.f32.gmra.mrb[4].mxu0 %v61_v12 }
  0x63   :  { %193 = vmatprep.mubr.f32.mxu0 %v4965_v0 }
  0x65   :  { %4060 = vmatmul.mubr.f32.gmra.mrb[2].mxu1 %v62_v13 }
  0x66   :  { %194 = vmatmul.mubr.f32.gmra.mrb[6].mxu0 %v62_v13 }
 0x12d   :  { %v177_v14 = vpop.f32.mrb[0].mxu0 }
 0x12e   :  { %v5049_v15 = vmul.f32 0.25, %v177_v14  ;;  %v179_v16 = vpop.f32.mrb[1].mxu0 }
 0x130   :  { %480 = vrot.lane.b32.xlu1 %v5049_v15, %s4966_s2  ;;  %4066 = vmatprep.mubr.msk.f32.mxu1 %vm287_vm0, %v5049_v15 }
 0x131   :  { %v183_v17 = vpop.f32.mrb[2].mxu0 }
 0x132   :  { %v185_v18 = vpop.f32.mrb[3].mxu0  ;;  %v5069_v24 = vmul.f32 0.25, %v183_v17 }
 0x133   :  { %v5061_v0 = vpack.i.bf16 %v185_v18, %v179_v16  ;;  %v4388_v20 = vpack.c.bf16 %v185_v18, %v179_v16 }
 0x134   :  { %v4058_v21 = vpop.f32.mrb[0].mxu1 }
 0x135   :  { %4602 = vrot.lane.b32.xlu1 %v5061_v0, %s4967_s27  ;;  %4390 = vmatprep.subr.msk.bf16.mxu1 %vm5057_vm1, %v4388_v20  ;;  %v266_v22 = vpop.f32.mrb[1].mxu1  ;;  %v5098_v54 = vpop.f32.mrb[4].mxu0 }
 0x136   :  { %4393 = vmatpush3.bf16.xpose.msk.msra.mxu1 %vm5057_vm1, %v4388_v20  ;;  %v4394_v23 = vpack.c.bf16 %v4058_v21, %v266_v22  ;;  %v5073_v27 = vpack.i.bf16 %v4058_v21, %v266_v22  ;;  %v191_v55 = vpop.f32.mrb[5].mxu0 }
 0x138   :  { %4395 = vmatprep.subr.bf16.mxu1 %v4394_v23  ;;  %v4061_v25 = vpop.f32.mrb[2].mxu1 }
 0x139   :  { %v276_v26 = vpop.f32.mrb[3].mxu1  ;;  %v5100_v56 = vpop.f32.mrb[6].mxu0 }
 0x13a   :  { %v5075_v28 = vpack.c.bf16 %v4061_v25, %v276_v26  ;;  %v5077_v29 = vpack.i.bf16 %v4061_v25, %v276_v26  ;;  %v197_v57 = vpop.f32.mrb[7].mxu0 }
 0x13b   :  { %v5109_v3 = vpack.i.bf16 %v197_v57, %v191_v55  ;;  %v5111_v4 = vpack.c.bf16 %v197_v57, %v191_v55 }
 0x13d   :  { %4067 = vmatmul.mubr.msk.f32.vlgmr.msra.gmra.mrb[4].mxu1 %vm287_vm0, %v5069_v24 }
 0x13e   :  { %4397 = vmatpush3.bf16.msra.mxu1 %v4394_v23 }
 0x1a2   :  { %v481_v30 = vpop.permute.xlu1 %480 }
 0x1a7   :  { %v4603_v31 = vpop.permute.xlu1 %4602 }
 0x1a8   :  { %v4605_v32 = vunpack.i.h.bf16 %v4603_v31  ;;  %v4604_v33 = vunpack.i.l.bf16 %v4603_v31 }
 0x1aa   :  { %v4408_v34 = vpack.c.bf16 %v4605_v32, %v4604_v33 }
 0x1ac   :  { %4410 = vmatprep.subr.msk.bf16.mxu0 %vm5057_vm1, %v4408_v34 }
 0x1ad   :  { %4413 = vmatpush3.bf16.xpose.msk.msra.mxu0 %vm5057_vm1, %v4408_v34 }
 0x210   :  { %v4068_v35 = vpop.f32.mrb[4].mxu1 }
 0x211   :  { %v366_v36 = vpop.f32.mrb[5].mxu1  ;;  %v378_v38 = vsel %vm287_vm0, %v4068_v35, -inf }
 0x212   :  { %v375_v37 = vsel %vm287_vm0, %v366_v36, -inf }
 0x213   :  { %376 = vmax.xlane.f32.xlu0 %v375_v37 }
 0x217   :  { %379 = vmax.xlane.f32.xlu0 %v378_v38 }
 0x22d   :  { %4597 = vrot.lane.b32.xlu0 %v5061_v0, %s4966_s2 }
 0x231   :  { %693 = vrot.lane.b32.xlu0 %v5049_v15, %s4967_s27 }
 0x2a0   :  { %v377_v39 = vpop.xlane.xlu0 %376 }
 0x2a1   :  { %v381_v40 = vsub.f32 %v366_v36, %v377_v39 }
 0x2a3   :  { %v383_v43 = vmul.f32 1.442695, %v381_v40 }
 0x2a4   :  { %v380_v41 = vpop.xlane.xlu0 %379 }
 0x2a5   :  { %v382_v42 = vsub.f32 %v4068_v35, %v380_v41 }
 0x2a7   :  { %v385_v44 = vmul.f32 1.442695, %v382_v42 }
 0x2a8   :  { %v4598_v45 = vpop.permute.xlu0 %4597 }
 0x2a9   :  { %4736 = vpow2.f32 %v385_v44  ;;  %v4600_v46 = vunpack.i.h.bf16 %v4598_v45  ;;  %v4599_v47 = vunpack.i.l.bf16 %v4598_v45 }
 0x2aa   :  { %4738 = vpow2.f32 %v383_v43 }
 0x2ab   :  { %v4398_v48 = vpack.c.bf16 %v4600_v46, %v4599_v47 }
 0x2ac   :  { %v694_v49 = vpop.permute.xlu0 %693 }
 0x2ad   :  { %4400 = vmatprep.subr.msk.bf16.mxu1 %vm5057_vm1, %v4398_v48  ;;  %4094 = vmatprep.mubr.msk.f32.mxu0 %vm287_vm0, %v694_v49 }
 0x2b3   :  { %v4737_v50 = vpop.eup %4736 }
 0x2b4   :  { %v390_v51 = vsel %vm287_vm0, %v4737_v50, 0.0  ;;  %v4739_v52 = vpop.eup %4738 }
 0x2b5   :  { %391 = vadd.xlane.f32.xlu1 %v390_v51  ;;  %v387_v53 = vsel %vm287_vm0, %v4739_v52, 0.0 }
 0x2b9   :  { %388 = vadd.xlane.f32.xlu1 %v387_v53 }
 0x2ca   :  { %482 = vrot.lane.b32.xlu1 %v5069_v24, %s4966_s2 }
 0x2ce   :  { %695 = vrot.lane.b32.xlu1 %v5069_v24, %s4967_s27 }
 0x342   :  { %v392_v58 = vpop.xlane.xlu1 %391 }
 0x343   :  { %4740 = vrcp.f32 %v392_v58 }
 0x346   :  { %v389_v59 = vpop.xlane.xlu1 %388 }
 0x347   :  { %4742 = vrcp.f32 %v389_v59 }
 0x34a   :  { %v483_v60 = vpop.permute.xlu1 %482 }
 0x34d   :  { %v4741_v62 = vpop.eup %4740 }
 0x34e   :  { %v696_v61 = vpop.permute.xlu1 %695  ;;  %v396_v2 = vmul.f32 %v4741_v62, %v4737_v50 }
 0x34f   :  { %4095 = vmatmul.mubr.msk.f32.vlgmr.msra.gmra.mrb[8].mxu0 %vm287_vm0, %v696_v61 }
 0x351   :  { %v4743_v63 = vpop.eup %4742 }
 0x352   :  { %v395_v1 = vmul.f32 %v4743_v63, %v4739_v52 }
 0x354   :  { %4073 = vmatprep.mubr.msk.f32.mxu1 %vm287_vm0, %v395_v1 }
 0x355   :  { %4074 = vmatmul.mubr.msk.f32.vlgmr.msra.gmra.mrb[6].mxu1 %vm287_vm0, %v396_v2 }
 0x356   :  { %4403 = vmatpush3.bf16.xpose.msk.msra.mxu1 %vm5057_vm1, %v4398_v48  ;;  %4080 = vmatprep.mubr.msk.f32.mxu1 %vm287_vm0, %v481_v30 }
 0x35d   :  { %4081 = vmatmul.mubr.msk.f32.vlgmr.msra.gmra.mrb[8].mxu1 %vm287_vm0, %v483_v60 }
 0x422   :  { %v4096_v5 = vpop.f32.mrb[8].mxu0 }
 0x423   :  { %v775_v6 = vpop.f32.mrb[9].mxu0  ;;  %v787_v14 = vsel %vm287_vm0, %v4096_v5, -inf }
 0x424   :  { %v784_v13 = vsel %vm287_vm0, %v775_v6, -inf }
 0x428   :  { %v4075_v7 = vpop.f32.mrb[6].mxu1 }
 0x429   :  { %479 = vst.msk [vmem:[#allocation2 + $0x8] sm:$0xff] %vm287_vm0, %v4075_v7  ;;  %v469_v8 = vpop.f32.mrb[7].mxu1 }
 0x42a   :  { %478 = vst.msk [vmem:[#allocation2] sm:$0xff] %vm287_vm0, %v469_v8 }
 0x430   :  { %v4082_v9 = vpop.f32.mrb[8].mxu1 }
 0x431   :  { %v562_v10 = vpop.f32.mrb[9].mxu1  ;;  %v574_v11 = vsel %vm287_vm0, %v4082_v9, -inf }
 0x432   :  { %575 = vmax.xlane.f32.xlu1 %v574_v11  ;;  %v571_v12 = vsel %vm287_vm0, %v562_v10, -inf }
 0x433   :  { %572 = vmax.xlane.f32.xlu0 %v571_v12 }
 0x437   :  { %785 = vmax.xlane.f32.xlu0 %v784_v13 }
 0x43b   :  { %788 = vmax.xlane.f32.xlu0 %v787_v14 }
 0x4bf   :  { %v576_v18 = vpop.xlane.xlu1 %575 }
 0x4c0   :  { %v573_v16 = vpop.xlane.xlu0 %572  ;;  %v578_v22 = vsub.f32 %v4082_v9, %v576_v18 }
 0x4c1   :  { %v577_v17 = vsub.f32 %v562_v10, %v573_v16 }
 0x4c2   :  { %v581_v31 = vmul.f32 1.442695, %v578_v22 }
 0x4c3   :  { %v579_v23 = vmul.f32 1.442695, %v577_v17 }
 0x4c4   :  { %v786_v20 = vpop.xlane.xlu0 %785 }
 0x4c5   :  { %v790_v21 = vsub.f32 %v775_v6, %v786_v20 }
 0x4c7   :  { %v792_v25 = vmul.f32 1.442695, %v790_v21 }
 0x4c8   :  { %v789_v26 = vpop.xlane.xlu0 %788 }
 0x4c9   :  { %4744 = vpow2.f32 %v792_v25  ;;  %v791_v30 = vsub.f32 %v4096_v5, %v789_v26 }
 0x4ca   :  { %4746 = vpow2.f32 %v579_v23 }
 0x4cb   :  { %v794_v32 = vmul.f32 1.442695, %v791_v30 }
 0x4cd   :  { %4748 = vpow2.f32 %v794_v32 }
 0x4ce   :  { %4750 = vpow2.f32 %v581_v31 }
 0x4d3   :  { %v4745_v33 = vpop.eup %4744 }
 0x4d4   :  { %v796_v34 = vsel %vm287_vm0, %v4745_v33, 0.0  ;;  %v4747_v35 = vpop.eup %4746 }
 0x4d5   :  { %797 = vadd.xlane.f32.xlu0 %v796_v34  ;;  %v583_v37 = vsel %vm287_vm0, %v4747_v35, 0.0 }
 0x4d7   :  { %v4749_v36 = vpop.eup %4748 }
 0x4d8   :  { %v799_v38 = vsel %vm287_vm0, %v4749_v36, 0.0  ;;  %v4751_v39 = vpop.eup %4750 }
 0x4d9   :  { %584 = vadd.xlane.f32.xlu0 %v583_v37  ;;  %800 = vadd.xlane.f32.xlu1 %v799_v38  ;;  %v586_v40 = vsel %vm287_vm0, %v4751_v39, 0.0 }
 0x4dd   :  { %587 = vadd.xlane.f32.xlu1 %v586_v40 }
 0x4ee   :  { %4612 = vrot.lane.b32.xlu1 %v5073_v27, %s4967_s27 }
 0x4ef   :  { %4607 = vrot.lane.b32.xlu0 %v5073_v27, %s4966_s2 }
 0x4f2   :  { %4617 = vrot.lane.b32.xlu1 %v5061_v0, %s4968_s28 }
 0x4f3   :  { %904 = vrot.lane.b32.xlu0 %v5049_v15, %s4968_s28 }
 0x4f6   :  { %4622 = vrot.lane.b32.xlu1 %v5061_v0, %s4969_s29 }
 0x4f7   :  { %1115 = vrot.lane.b32.xlu0 %v5049_v15, %s4969_s29 }
 0x4fa   :  { %906 = vrot.lane.b32.xlu1 %v5069_v24, %s4968_s28 }
 0x4fe   :  { %1117 = vrot.lane.b32.xlu1 %v5069_v24, %s4969_s29 }
 0x562   :  { %v798_v41 = vpop.xlane.xlu0 %797 }
 0x566   :  { %v801_v42 = vpop.xlane.xlu1 %800  ;;  %v585_v43 = vpop.xlane.xlu0 %584 }
 0x567   :  { %4752 = vrcp.f32 %v585_v43 }
 0x568   :  { %4754 = vrcp.f32 %v798_v41 }
 0x56a   :  { %v588_v44 = vpop.xlane.xlu1 %587  ;;  %v4608_v45 = vpop.permute.xlu0 %4607 }
 0x56b   :  { %4756 = vrcp.f32 %v588_v44  ;;  %v4610_v46 = vunpack.i.h.bf16 %v4608_v45  ;;  %v4609_v47 = vunpack.i.l.bf16 %v4608_v45 }
 0x56c   :  { %4758 = vrcp.f32 %v801_v42 }
 0x56d   :  { %v4404_v48 = vpack.c.bf16 %v4610_v46, %v4609_v47 }
 0x56e   :  { %v4613_v49 = vpop.permute.xlu1 %4612  ;;  %v905_v7 = vpop.permute.xlu0 %904 }
 0x56f   :  { %v4615_v50 = vunpack.i.h.bf16 %v4613_v49  ;;  %v4614_v51 = vunpack.i.l.bf16 %v4613_v49  ;;  %4405 = vmatprep.subr.bf16.mxu1 %v4404_v48 }
 0x570   :  { %4407 = vmatpush3.bf16.msra.mxu1 %v4404_v48 }
 0x571   :  { %v4414_v52 = vpack.c.bf16 %v4615_v50, %v4614_v51  ;;  %v4753_v53 = vpop.eup %4752 }
 0x572   :  { %v4618_v55 = vpop.permute.xlu1 %4617  ;;  %v591_v57 = vmul.f32 %v4753_v53, %v4747_v35  ;;  %v4755_v58 = vpop.eup %4754 }
 0x573   :  { %4415 = vmatprep.subr.bf16.mxu1 %v4414_v52  ;;  %v4620_v59 = vunpack.i.h.bf16 %v4618_v55  ;;  %v4619_v60 = vunpack.i.l.bf16 %v4618_v55  ;;  %v804_v1 = vmul.f32 %v4755_v58, %v4745_v33  ;;  %v1116_v12 = vpop.permute.xlu0 %1115 }
 0x574   :  { %4087 = vmatprep.mubr.msk.f32.mxu1 %vm287_vm0, %v591_v57 }
 0x575   :  { %v4757_v61 = vpop.eup %4756  ;;  %v4418_v2 = vpack.c.bf16 %v4620_v59, %v4619_v60 }
 0x576   :  { %v592_v62 = vmul.f32 %v4757_v61, %v4751_v39  ;;  %v4759_v63 = vpop.eup %4758  ;;  %v4623_v5 = vpop.permute.xlu1 %4622 }
 0x577   :  { %v805_v6 = vmul.f32 %v4759_v63, %v4749_v36  ;;  %v4625_v8 = vunpack.i.h.bf16 %v4623_v5  ;;  %v4624_v9 = vunpack.i.l.bf16 %v4623_v5 }
 0x578   :  { %4088 = vmatmul.mubr.msk.f32.vlgmr.msra.gmra.mrb[10].mxu1 %vm287_vm0, %v592_v62 }
 0x579   :  { %4417 = vmatpush3.bf16.msra.mxu1 %v4414_v52  ;;  %4101 = vmatprep.mubr.msk.f32.mxu1 %vm287_vm0, %v804_v1  ;;  %v4428_v10 = vpack.c.bf16 %v4625_v8, %v4624_v9 }
 0x57a   :  { %4420 = vmatprep.subr.msk.bf16.mxu1 %vm5057_vm1, %v4418_v2  ;;  %v907_v11 = vpop.permute.xlu1 %906 }
 0x57c   :  { %4102 = vmatmul.mubr.msk.f32.vlgmr.msra.gmra.mrb[12].mxu1 %vm287_vm0, %v805_v6 }
 0x57d   :  { %4108 = vmatprep.mubr.msk.f32.mxu1 %vm287_vm0, %v905_v7 }
 0x57e   :  { %v1118_v13 = vpop.permute.xlu1 %1117 }
 0x582   :  { %4423 = vmatpush3.bf16.xpose.msk.msra.mxu1 %vm5057_vm1, %v4418_v2 }
 0x583   :  { %4430 = vmatprep.subr.msk.bf16.mxu1 %vm5057_vm1, %v4428_v10 }
 0x589   :  { %4109 = vmatmul.mubr.msk.f32.vlgmr.msra.gmra.mrb[14].mxu1 %vm287_vm0, %v907_v11 }
 0x58a   :  { %4433 = vmatpush3.bf16.xpose.msk.msra.mxu1 %vm5057_vm1, %v4428_v10  ;;  %4122 = vmatprep.mubr.msk.f32.mxu1 %vm287_vm0, %v1116_v12 }
 0x591   :  { %4123 = vmatmul.mubr.msk.f32.vlgmr.msra.gmra.mrb[16].mxu1 %vm287_vm0, %v1118_v13 }
 0x64b   :  { %v5155_v14 = vpop.f32.mrb[10].mxu1 }
 0x64c   :  { %v5157_v16 = vpop.f32.mrb[11].mxu1 }
 0x64f   :  { %v5159_v17 = vpop.f32.mrb[12].mxu1 }
 0x650   :  { %v5161_v18 = vpop.f32.mrb[13].mxu1 }
 0x65c   :  { %v4110_v20 = vpop.f32.mrb[14].mxu1 }
 0x65d   :  { %v5163_v21 = vpop.f32.mrb[15].mxu1  ;;  %v998_v30 = vsel %vm287_vm0, %v4110_v20, -inf }
 0x65e   :  { %v995_v47 = vsel %vm287_vm0, %v5163_v21, -inf }
 0x664   :  { %v4124_v22 = vpop.f32.mrb[16].mxu1 }
 0x665   :  { %v1197_v23 = vpop.f32.mrb[17].mxu1  ;;  %v1209_v25 = vsel %vm287_vm0, %v4124_v22, -inf }
 0x666   :  { %1210 = vmax.xlane.f32.xlu1 %v1209_v25  ;;  %v1206_v26 = vsel %vm287_vm0, %v1197_v23, -inf }
 0x667   :  { %1207 = vmax.xlane.f32.xlu0 %v1206_v26 }
 0x677   :  { %4632 = vrot.lane.b32.xlu1 %v5061_v0, %s4970_s30 }
 0x67b   :  { %1326 = vrot.lane.b32.xlu1 %v5049_v15, %s4970_s30 }
 0x67f   :  { %1328 = vrot.lane.b32.xlu1 %v5069_v24, %s4970_s30 }
 0x6a3   :  { %999 = vmax.xlane.f32.xlu1 %v998_v30 }
 0x6f3   :  { %v1211_v31 = vpop.xlane.xlu1 %1210 }
 0x6f4   :  { %v1213_v32 = vsub.f32 %v4124_v22, %v1211_v31  ;;  %v1208_v33 = vpop.xlane.xlu0 %1207 }
 0x6f5   :  { %v1212_v34 = vsub.f32 %v1197_v23, %v1208_v33 }
 0x6f6   :  { %v1216_v35 = vmul.f32 1.442695, %v1213_v32 }
 0x6f7   :  { %v1214_v36 = vmul.f32 1.442695, %v1212_v34  ;;  %v4633_v41 = vpop.permute.xlu1 %4632 }
 0x6f8   :  { %4760 = vpow2.f32 %v1216_v35  ;;  %v4635_v53 = vunpack.i.h.bf16 %v4633_v41  ;;  %v4634_v55 = vunpack.i.l.bf16 %v4633_v41 }
 0x6f9   :  { %4762 = vpow2.f32 %v1214_v36 }
 0x6fa   :  { %v4438_v60 = vpack.c.bf16 %v4635_v53, %v4634_v55 }
 0x6fb   :  { %v1327_v42 = vpop.permute.xlu1 %1326 }
 0x6ff   :  { %v1329_v43 = vpop.permute.xlu1 %1328 }
 0x702   :  { %v4761_v37 = vpop.eup %4760 }
 0x703   :  { %v1221_v38 = vsel %vm287_vm0, %v4761_v37, 0.0  ;;  %v4763_v39 = vpop.eup %4762 }
 0x704   :  { %1222 = vadd.xlane.f32.xlu0 %v1221_v38  ;;  %v1218_v40 = vsel %vm287_vm0, %v4763_v39, 0.0 }
 0x708   :  { %1219 = vadd.xlane.f32.xlu0 %v1218_v40 }
 0x71e   :  { %4627 = vrot.lane.b32.xlu0 %v5073_v27, %s4969_s29 }
 0x730   :  { %v1000_v44 = vpop.xlane.xlu1 %999 }
 0x731   :  { %v1002_v45 = vsub.f32 %v4110_v20, %v1000_v44 }
 0x733   :  { %v1005_v46 = vmul.f32 1.442695, %v1002_v45 }
 0x735   :  { %4764 = vpow2.f32 %v1005_v46 }
 0x73d   :  { %996 = vmax.xlane.f32.xlu0 %v995_v47 }
 0x73f   :  { %v5180_v48 = vpop.eup %4764 }
 0x740   :  { %v1010_v49 = vsel %vm287_vm0, %v5180_v48, 0.0 }
 0x741   :  { %1011 = vadd.xlane.f32.xlu1 %v1010_v49 }
 0x791   :  { %v1223_v50 = vpop.xlane.xlu0 %1222 }
 0x792   :  { %4766 = vrcp.f32 %v1223_v50 }
 0x795   :  { %v1220_v51 = vpop.xlane.xlu0 %1219 }
 0x796   :  { %4768 = vrcp.f32 %v1220_v51 }
 0x799   :  { %v4628_v52 = vpop.permute.xlu0 %4627 }
 0x79a   :  { %v4630_v57 = vunpack.i.h.bf16 %v4628_v52  ;;  %v4629_v58 = vunpack.i.l.bf16 %v4628_v52 }
 0x79c   :  { %v4434_v59 = vpack.c.bf16 %v4630_v57, %v4629_v58  ;;  %v4767_v61 = vpop.eup %4766 }
 0x79d   :  { %v1227_v1 = vmul.f32 %v4767_v61, %v4761_v37 }
 0x79e   :  { %4435 = vmatprep.subr.bf16.mxu1 %v4434_v59 }
 0x79f   :  { %4437 = vmatpush3.bf16.msra.mxu1 %v4434_v59 }
 0x7a0   :  { %v4769_v62 = vpop.eup %4768  ;;  %4440 = vmatprep.subr.msk.bf16.mxu1 %vm5057_vm1, %v4438_v60 }
 0x7a1   :  { %v1226_v63 = vmul.f32 %v4769_v62, %v4763_v39 }
 0x7a3   :  { %4129 = vmatprep.mubr.msk.f32.mxu1 %vm287_vm0, %v1226_v63 }
 0x7a4   :  { %4130 = vmatmul.mubr.msk.f32.vlgmr.msra.gmra.mrb[18].mxu1 %vm287_vm0, %v1227_v1 }
 0x7a5   :  { %4136 = vmatprep.mubr.msk.f32.mxu1 %vm287_vm0, %v1327_v42 }
 0x7a8   :  { %4443 = vmatpush3.bf16.xpose.msk.msra.mxu1 %vm5057_vm1, %v4438_v60 }
 0x7af   :  { %4137 = vmatmul.mubr.msk.f32.vlgmr.msra.gmra.mrb[20].mxu1 %vm287_vm0, %v1329_v43 }
 0x7ca   :  { %v997_v2 = vpop.xlane.xlu0 %996 }
 0x7cb   :  { %v1001_v5 = vsub.f32 %v5163_v21, %v997_v2 }
 0x7cd   :  { %v1003_v8 = vmul.f32 1.442695, %v1001_v5 }
 0x7ce   :  { %v1012_v38 = vpop.xlane.xlu1 %1011 }
 0x7cf   :  { %4770 = vpow2.f32 %v1003_v8 }
 0x7d9   :  { %v4771_v13 = vpop.eup %4770 }
 0x7da   :  { %v1007_v20 = vsel %vm287_vm0, %v4771_v13, 0.0 }
 0x877   :  { %v5193_v6 = vpop.f32.mrb[18].mxu1 }
 0x878   :  { %v5195_v7 = vpop.f32.mrb[19].mxu1 }
 0x882   :  { %v4138_v9 = vpop.f32.mrb[20].mxu1 }
 0x883   :  { %v1408_v10 = vpop.f32.mrb[21].mxu1  ;;  %v1420_v12 = vsel %vm287_vm0, %v4138_v9, -inf }
 0x884   :  { %v1417_v11 = vsel %vm287_vm0, %v1408_v10, -inf }
 0x885   :  { %1418 = vmax.xlane.f32.xlu0 %v1417_v11 }
 0x889   :  { %1421 = vmax.xlane.f32.xlu0 %v1420_v12 }
 0x88d   :  { %1008 = vadd.xlane.f32.xlu0 %v1007_v20 }
 0x912   :  { %v1419_v22 = vpop.xlane.xlu0 %1418 }
 0x913   :  { %v1423_v21 = vsub.f32 %v1408_v10, %v1419_v22 }
 0x915   :  { %v1425_v23 = vmul.f32 1.442695, %v1423_v21 }
 0x916   :  { %v1422_v25 = vpop.xlane.xlu0 %1421 }
 0x917   :  { %4772 = vpow2.f32 %v1425_v23  ;;  %v1424_v26 = vsub.f32 %v4138_v9, %v1422_v25 }
 0x919   :  { %v1427_v30 = vmul.f32 1.442695, %v1424_v26 }
 0x91a   :  { %v1009_v31 = vpop.xlane.xlu0 %1008 }
 0x91b   :  { %4774 = vpow2.f32 %v1427_v30 }
 0x91c   :  { %4776 = vrcp.f32 %v1009_v31 }
 0x91d   :  { %4778 = vrcp.f32 %v1012_v38 }
 0x921   :  { %v4773_v32 = vpop.eup %4772 }
 0x922   :  { %v1429_v33 = vsel %vm287_vm0, %v4773_v32, 0.0 }
 0x923   :  { %1430 = vadd.xlane.f32.xlu0 %v1429_v33 }
 0x925   :  { %v4775_v34 = vpop.eup %4774 }
 0x926   :  { %v4777_v35 = vpop.eup %4776  ;;  %v1432_v36 = vsel %vm287_vm0, %v4775_v34, 0.0 }
 0x927   :  { %1433 = vadd.xlane.f32.xlu1 %v1432_v36  ;;  %v1015_v37 = vmul.f32 %v4777_v35, %v4771_v13  ;;  %v4779_v45 = vpop.eup %4778 }
 0x928   :  { %v1016_v51 = vmul.f32 %v4779_v45, %v5180_v48 }
 0x929   :  { %4115 = vmatprep.mubr.msk.f32.mxu0 %vm287_vm0, %v1015_v37 }
 0x938   :  { %4642 = vrot.lane.b32.xlu1 %v5073_v27, %s4970_s30 }
 0x939   :  { %4637 = vrot.lane.b32.xlu0 %v5073_v27, %s4968_s28 }
 0x93c   :  { %4647 = vrot.lane.b32.xlu1 %v5061_v0, %s4971_s5 }
 0x93d   :  { %1539 = vrot.lane.b32.xlu0 %v5069_v24, %s4971_s5 }
 0x940   :  { %1537 = vrot.lane.b32.xlu1 %v5049_v15, %s4971_s5 }
 0x9b0   :  { %v1431_v39 = vpop.xlane.xlu0 %1430 }
 0x9b1   :  { %4780 = vrcp.f32 %v1431_v39 }
 0x9b4   :  { %v1434_v40 = vpop.xlane.xlu1 %1433  ;;  %v4638_v41 = vpop.permute.xlu0 %4637 }
 0x9b5   :  { %4782 = vrcp.f32 %v1434_v40  ;;  %v4640_v42 = vunpack.i.h.bf16 %v4638_v41  ;;  %v4639_v43 = vunpack.i.l.bf16 %v4638_v41 }
 0x9b7   :  { %v4424_v44 = vpack.c.bf16 %v4640_v42, %v4639_v43 }
 0x9b8   :  { %v4643_v46 = vpop.permute.xlu1 %4642  ;;  %v1540_v48 = vpop.permute.xlu0 %1539 }
 0x9b9   :  { %v4645_v47 = vunpack.i.h.bf16 %v4643_v46  ;;  %v4644_v49 = vunpack.i.l.bf16 %v4643_v46  ;;  %4425 = vmatprep.subr.bf16.mxu0 %v4424_v44 }
 0x9ba   :  { %4427 = vmatpush3.bf16.msra.mxu0 %v4424_v44 }
 0x9bb   :  { %v4781_v50 = vpop.eup %4780  ;;  %v4444_v52 = vpack.c.bf16 %v4645_v47, %v4644_v49 }
 0x9bc   :  { %v4648_v53 = vpop.permute.xlu1 %4647  ;;  %v1437_v55 = vmul.f32 %v4781_v50, %v4773_v32 }
 0x9bd   :  { %v4650_v57 = vunpack.i.h.bf16 %v4648_v53  ;;  %v4649_v58 = vunpack.i.l.bf16 %v4648_v53  ;;  %4116 = vmatmul.mubr.msk.f32.vlgmr.msra.gmra.mrb[10].mxu0 %vm287_vm0, %v1016_v51  ;;  %4445 = vmatprep.subr.bf16.mxu0 %v4444_v52 }
 0x9be   :  { %4447 = vmatpush3.bf16.msra.mxu0 %v4444_v52  ;;  %4143 = vmatprep.mubr.msk.f32.mxu0 %vm287_vm0, %v1437_v55 }
 0x9bf   :  { %v4783_v59 = vpop.eup %4782  ;;  %v4448_v60 = vpack.c.bf16 %v4650_v57, %v4649_v58 }
 0x9c0   :  { %v1438_v61 = vmul.f32 %v4783_v59, %v4775_v34  ;;  %v1538_v62 = vpop.permute.xlu1 %1537 }
 0x9c1   :  { %4450 = vmatprep.subr.msk.bf16.mxu0 %vm5057_vm1, %v4448_v60 }
 0x9c2   :  { %4144 = vmatmul.mubr.msk.f32.vlgmr.msra.gmra.mrb[12].mxu0 %vm287_vm0, %v1438_v61 }
 0x9c3   :  { %4150 = vmatprep.mubr.msk.f32.mxu0 %vm287_vm0, %v1538_v62 }
 0x9c7   :  { %4453 = vmatpush3.bf16.xpose.msk.msra.mxu0 %vm5057_vm1, %v4448_v60 }
 0x9ce   :  { %4151 = vmatmul.mubr.msk.f32.vlgmr.msra.gmra.mrb[14].mxu0 %vm287_vm0, %v1540_v48 }
 0xa90   :  { %v5223_v63 = vpop.f32.mrb[10].mxu0 }
 0xa91   :  { %v5225_v1 = vpop.f32.mrb[11].mxu0 }
 0xa95   :  { %v5227_v2 = vpop.f32.mrb[12].mxu0 }
 0xa96   :  { %v5229_v5 = vpop.f32.mrb[13].mxu0 }
 0xaa1   :  { %v4152_v8 = vpop.f32.mrb[14].mxu0 }
 0xaa2   :  { %v1619_v9 = vpop.f32.mrb[15].mxu0  ;;  %v1631_v10 = vsel %vm287_vm0, %v4152_v8, -inf }
 0xaa3   :  { %1632 = vmax.xlane.f32.xlu0 %v1631_v10  ;;  %v1628_v11 = vsel %vm287_vm0, %v1619_v9, -inf }
 0xaa4   :  { %1629 = vmax.xlane.f32.xlu1 %v1628_v11 }
 0xab5   :  { %4652 = vrot.lane.b32.xlu1 %v5073_v27, %s4971_s5 }
 0xab9   :  { %1748 = vrot.lane.b32.xlu1 %v5049_v15, %s4972_s6 }
 0xabd   :  { %1750 = vrot.lane.b32.xlu1 %v5069_v24, %s4972_s6 }
 0xb30   :  { %v1633_v12 = vpop.xlane.xlu0 %1632 }
 0xb31   :  { %v1635_v13 = vsub.f32 %v4152_v8, %v1633_v12  ;;  %v1630_v20 = vpop.xlane.xlu1 %1629 }
 0xb32   :  { %v1634_v22 = vsub.f32 %v1619_v9, %v1630_v20 }
 0xb33   :  { %v1638_v21 = vmul.f32 1.442695, %v1635_v13 }
 0xb34   :  { %v1636_v23 = vmul.f32 1.442695, %v1634_v22 }
 0xb35   :  { %4784 = vpow2.f32 %v1638_v21  ;;  %v4653_v25 = vpop.permute.xlu1 %4652 }
 0xb36   :  { %v4655_v26 = vunpack.i.h.bf16 %v4653_v25  ;;  %v4654_v30 = vunpack.i.l.bf16 %v4653_v25  ;;  %4786 = vpow2.f32 %v1636_v23 }
 0xb38   :  { %v4454_v31 = vpack.c.bf16 %v4655_v26, %v4654_v30  ;;  %v5277_v30 = vmul.f32 0.25, %v5098_v54 }
 0xb39   :  { %v1749_v44 = vpop.permute.xlu1 %1748 }
 0xb3a   :  { %4455 = vmatprep.subr.bf16.mxu1 %v4454_v31 }
 0xb3b   :  { %4457 = vmatpush3.bf16.msra.mxu1 %v4454_v31 }
 0xb3f   :  { %v4785_v32 = vpop.eup %4784 }
 0xb40   :  { %v1643_v15 = vsel %vm287_vm0, %v4785_v32, 0.0  ;;  %v4787_v33 = vpop.eup %4786 }
 0xb41   :  { %1644 = vadd.xlane.f32.xlu0 %v1643_v15  ;;  %v1640_v24 = vsel %vm287_vm0, %v4787_v33, 0.0 }
 0xb45   :  { %1641 = vadd.xlane.f32.xlu0 %v1640_v24 }
 0xb5b   :  { %4657 = vrot.lane.b32.xlu0 %v5061_v0, %s4972_s6  ;;  %v1751_v0 = vpop.permute.xlu1 %1750 }
 0xbce   :  { %v1645_v34 = vpop.xlane.xlu0 %1644 }
 0xbcf   :  { %4788 = vrcp.f32 %v1645_v34 }
 0xbd2   :  { %v1642_v35 = vpop.xlane.xlu0 %1641 }
 0xbd3   :  { %4790 = vrcp.f32 %v1642_v35 }
 0xbd6   :  { %v4658_v36 = vpop.permute.xlu0 %4657 }
 0xbd7   :  { %v4660_v37 = vunpack.i.h.bf16 %v4658_v36  ;;  %v4659_v38 = vunpack.i.l.bf16 %v4658_v36 }
 0xbd9   :  { %v4458_v39 = vpack.c.bf16 %v4660_v37, %v4659_v38  ;;  %v4789_v40 = vpop.eup %4788 }
 0xbda   :  { %v1649_v43 = vmul.f32 %v4789_v40, %v4785_v32 }
 0xbdb   :  { %4460 = vmatprep.subr.msk.bf16.mxu1 %vm5057_vm1, %v4458_v39 }
 0xbdd   :  { %v4791_v41 = vpop.eup %4790 }
 0xbde   :  { %v1648_v42 = vmul.f32 %v4791_v41, %v4787_v33 }
 0xbe0   :  { %4157 = vmatprep.mubr.msk.f32.mxu1 %vm287_vm0, %v1648_v42 }
 0xbe1   :  { %4158 = vmatmul.mubr.msk.f32.vlgmr.msra.gmra.mrb[22].mxu1 %vm287_vm0, %v1649_v43 }
 0xbe2   :  { %4463 = vmatpush3.bf16.xpose.msk.msra.mxu1 %vm5057_vm1, %v4458_v39  ;;  %4164 = vmatprep.mubr.msk.f32.mxu1 %vm287_vm0, %v1749_v44 }
 0xbe3   :  { %4475 = vmatprep.subr.bf16.mxu1 %v5075_v28 }
 0xbe9   :  { %4165 = vmatmul.mubr.msk.f32.vlgmr.msra.gmra.mrb[24].mxu1 %vm287_vm0, %v1751_v0 }
 0xbea   :  { %4477 = vmatpush3.bf16.msra.mxu1 %v5075_v28  ;;  %v5264_v28 = vmul.f32 0.25, %v5100_v56 }
 0xcb4   :  { %v5253_v45 = vpop.f32.mrb[22].mxu1 }
 0xcb5   :  { %v5255_v46 = vpop.f32.mrb[23].mxu1 }
 0xcbc   :  { %v4166_v47 = vpop.f32.mrb[24].mxu1 }
 0xcbd   :  { %v1830_v49 = vpop.f32.mrb[25].mxu1  ;;  %v1842_v50 = vsel %vm287_vm0, %v4166_v47, -inf }
 0xcbe   :  { %1843 = vmax.xlane.f32.xlu0 %v1842_v50  ;;  %v1839_v51 = vsel %vm287_vm0, %v1830_v49, -inf }
 0xcbf   :  { %1840 = vmax.xlane.f32.xlu1 %v1839_v51 }
 0xcd0   :  { %4662 = vrot.lane.b32.xlu1 %v5073_v27, %s4972_s6 }
 0xcd4   :  { %4667 = vrot.lane.b32.xlu1 %v5109_v3, %s4966_s2 }
 0xcd8   :  { %2155 = vrot.lane.b32.xlu1 %v5264_v28, %s4966_s2 }
 0xd4b   :  { %v1844_v52 = vpop.xlane.xlu0 %1843 }
 0xd4c   :  { %v1846_v53 = vsub.f32 %v4166_v47, %v1844_v52  ;;  %v1841_v55 = vpop.xlane.xlu1 %1840 }
 0xd4d   :  { %v1845_v57 = vsub.f32 %v1830_v49, %v1841_v55 }
 0xd4e   :  { %v1849_v58 = vmul.f32 1.442695, %v1846_v53 }
 0xd4f   :  { %v1847_v59 = vmul.f32 1.442695, %v1845_v57 }
 0xd50   :  { %v4663_v60 = vpop.permute.xlu1 %4662 }
 0xd51   :  { %4792 = vpow2.f32 %v1847_v59  ;;  %v4665_v61 = vunpack.i.h.bf16 %v4663_v60  ;;  %v4664_v62 = vunpack.i.l.bf16 %v4663_v60 }
 0xd52   :  { %4794 = vpow2.f32 %v1849_v58 }
 0xd53   :  { %v4464_v27 = vpack.c.bf16 %v4665_v61, %v4664_v62 }
 0xd54   :  { %v4668_v48 = vpop.permute.xlu1 %4667 }
 0xd55   :  { %v4670_v8 = vunpack.i.h.bf16 %v4668_v48  ;;  %v4669_v9 = vunpack.i.l.bf16 %v4668_v48  ;;  %4465 = vmatprep.subr.bf16.mxu0 %v4464_v27 }
 0xd56   :  { %4467 = vmatpush3.bf16.msra.mxu0 %v4464_v27 }
 0xd57   :  { %v4478_v56 = vpack.c.bf16 %v4670_v8, %v4669_v9  ;;  %4470 = vmatprep.subr.msk.bf16.mxu0 %vm5057_vm1, %v5111_v4 }
 0xd58   :  { %v2156_v52 = vpop.permute.xlu1 %2155 }
 0xd59   :  { %4480 = vmatprep.subr.msk.bf16.mxu1 %vm5057_vm1, %v4478_v56 }
 0xd5b   :  { %v4793_v10 = vpop.eup %4792 }
 0xd5c   :  { %v1851_v11 = vsel %vm287_vm0, %v4793_v10, 0.0  ;;  %v4795_v12 = vpop.eup %4794 }
 0xd5d   :  { %1852 = vadd.xlane.f32.xlu0 %v1851_v11  ;;  %v1854_v13 = vsel %vm287_vm0, %v4795_v12, 0.0 }
 0xd61   :  { %1855 = vadd.xlane.f32.xlu0 %v1854_v13 }
 0xdea   :  { %v1853_v20 = vpop.xlane.xlu0 %1852 }
 0xdeb   :  { %4796 = vrcp.f32 %v1853_v20 }
 0xdee   :  { %v1856_v22 = vpop.xlane.xlu0 %1855 }
 0xdef   :  { %4798 = vrcp.f32 %v1856_v22 }
 0xdf5   :  { %v4797_v21 = vpop.eup %4796 }
 0xdf6   :  { %v1859_v23 = vmul.f32 %v4797_v21, %v4793_v10 }
 0xdf8   :  { %4171 = vmatprep.mubr.msk.f32.mxu0 %vm287_vm0, %v1859_v23 }
 0xdf9   :  { %v4799_v25 = vpop.eup %4798 }
 0xdfa   :  { %v1860_v26 = vmul.f32 %v4799_v25, %v4795_v12 }
 0xdfc   :  { %4172 = vmatmul.mubr.msk.f32.vlgmr.msra.gmra.mrb[16].mxu0 %vm287_vm0, %v1860_v26 }
 0xdfd   :  { %4473 = vmatpush3.bf16.xpose.msk.msra.mxu0 %vm5057_vm1, %v5111_v4  ;;  %4178 = vmatprep.mubr.msk.f32.mxu0 %vm287_vm0, %v5277_v30 }
 0xe04   :  { %4179 = vmatmul.mubr.msk.f32.vlgmr.msra.gmra.mrb[18].mxu0 %vm287_vm0, %v5264_v28 }
 0xecf   :  { %v5287_v31 = vpop.f32.mrb[16].mxu0 }
 0xed0   :  { %v5289_v32 = vpop.f32.mrb[17].mxu0 }
 0xed7   :  { %v4180_v15 = vpop.f32.mrb[18].mxu0 }
 0xed8   :  { %v2039_v33 = vpop.f32.mrb[19].mxu0  ;;  %v2051_v24 = vsel %vm287_vm0, %v4180_v15, -inf }
 0xed9   :  { %v2048_v54 = vsel %vm287_vm0, %v2039_v33, -inf }
 0xeda   :  { %2049 = vmax.xlane.f32.xlu0 %v2048_v54 }
 0xede   :  { %2052 = vmax.xlane.f32.xlu0 %v2051_v24 }
 0xf67   :  { %v2050_v34 = vpop.xlane.xlu0 %2049 }
 0xf68   :  { %v2054_v4 = vsub.f32 %v2039_v33, %v2050_v34 }
 0xf6a   :  { %v2056_v35 = vmul.f32 1.442695, %v2054_v4 }
 0xf6b   :  { %v2053_v36 = vpop.xlane.xlu0 %2052 }
 0xf6c   :  { %4800 = vpow2.f32 %v2056_v35  ;;  %v2055_v37 = vsub.f32 %v4180_v15, %v2053_v36 }
 0xf6e   :  { %v2058_v38 = vmul.f32 1.442695, %v2055_v37 }
 0xf70   :  { %4802 = vpow2.f32 %v2058_v38 }
 0xf76   :  { %v4801_v39 = vpop.eup %4800 }
 0xf77   :  { %v2060_v40 = vsel %vm287_vm0, %v4801_v39, 0.0 }
 0xf78   :  { %2061 = vadd.xlane.f32.xlu0 %v2060_v40 }
 0xf7a   :  { %v4803_v41 = vpop.eup %4802 }
 0xf7b   :  { %v2063_v42 = vsel %vm287_vm0, %v4803_v41, 0.0 }
 0xf7c   :  { %2064 = vadd.xlane.f32.xlu0 %v2063_v42 }
 0xf92   :  { %2153 = vrot.lane.b32.xlu0 %v5277_v30, %s4966_s2 }
0x1005   :  { %v2062_v43 = vpop.xlane.xlu0 %2061 }
0x1006   :  { %4804 = vrcp.f32 %v2062_v43 }
0x1009   :  { %v2065_v44 = vpop.xlane.xlu0 %2064 }
0x100a   :  { %4806 = vrcp.f32 %v2065_v44 }
0x100d   :  { %v2154_v51 = vpop.permute.xlu0 %2153 }
0x1010   :  { %v4805_v0 = vpop.eup %4804 }
0x1011   :  { %v2068_v47 = vmul.f32 %v4805_v0, %v4801_v39 }
0x1013   :  { %4185 = vmatprep.mubr.msk.f32.mxu1 %vm287_vm0, %v2068_v47 }
0x1014   :  { %v4807_v49 = vpop.eup %4806 }
0x1015   :  { %v2069_v50 = vmul.f32 %v4807_v49, %v4803_v41 }
0x1017   :  { %4186 = vmatmul.mubr.msk.f32.vlgmr.msra.gmra.mrb[26].mxu1 %vm287_vm0, %v2069_v50 }
0x1018   :  { %4483 = vmatpush3.bf16.xpose.msk.msra.mxu1 %vm5057_vm1, %v4478_v56  ;;  %4192 = vmatprep.mubr.msk.f32.mxu1 %vm287_vm0, %v2154_v51 }
0x101f   :  { %4193 = vmatmul.mubr.msk.f32.vlgmr.msra.gmra.mrb[28].mxu1 %vm287_vm0, %v2156_v52 }
0x10ea   :  { %v4187_v53 = vpop.f32.mrb[26].mxu1 }
0x10eb   :  { %2152 = vst.msk [vmem:[#allocation2 + $0x18] sm:$0xff] %vm287_vm0, %v4187_v53  ;;  %v2142_v55 = vpop.f32.mrb[27].mxu1 }
0x10ec   :  { %2151 = vst.msk [vmem:[#allocation2 + $0x10] sm:$0xff] %vm287_vm0, %v2142_v55 }
0x10f2   :  { %v4194_v57 = vpop.f32.mrb[28].mxu1 }
0x10f3   :  { %v2235_v58 = vpop.f32.mrb[29].mxu1  ;;  %v2247_v59 = vsel %vm287_vm0, %v4194_v57, -inf }
0x10f4   :  { %2248 = vmax.xlane.f32.xlu0 %v2247_v59  ;;  %v2244_v60 = vsel %vm287_vm0, %v2235_v58, -inf }
0x10f5   :  { %2245 = vmax.xlane.f32.xlu1 %v2244_v60 }
0x1106   :  { %4672 = vrot.lane.b32.xlu1 %v5077_v29, %s4966_s2 }
0x110a   :  { %4677 = vrot.lane.b32.xlu0 %v5109_v3, %s4967_s27  ;;  %2365 = vrot.lane.b32.xlu1 %v5277_v30, %s4967_s27 }
0x1181   :  { %v2249_v61 = vpop.xlane.xlu0 %2248 }
0x1182   :  { %v2251_v62 = vsub.f32 %v4194_v57, %v2249_v61  ;;  %v2246_v27 = vpop.xlane.xlu1 %2245 }
0x1183   :  { %v2250_v48 = vsub.f32 %v2235_v58, %v2246_v27 }
0x1184   :  { %v2254_v8 = vmul.f32 1.442695, %v2251_v62 }
0x1185   :  { %v2252_v9 = vmul.f32 1.442695, %v2250_v48  ;;  %v4678_v56 = vpop.permute.xlu0 %4677 }
0x1186   :  { %4808 = vpow2.f32 %v2254_v8  ;;  %v4673_v10 = vpop.permute.xlu1 %4672  ;;  %v4680_v11 = vunpack.i.h.bf16 %v4678_v56  ;;  %v4679_v12 = vunpack.i.l.bf16 %v4678_v56 }
0x1187   :  { %v4675_v13 = vunpack.i.h.bf16 %v4673_v10  ;;  %v4674_v20 = vunpack.i.l.bf16 %v4673_v10  ;;  %4810 = vpow2.f32 %v2252_v9 }
0x1188   :  { %v4488_v21 = vpack.c.bf16 %v4680_v11, %v4679_v12 }
0x1189   :  { %v4484_v22 = vpack.c.bf16 %v4675_v13, %v4674_v20 }
0x118a   :  { %v2366_v33 = vpop.permute.xlu1 %2365 }
0x118b   :  { %4485 = vmatprep.subr.bf16.mxu0 %v4484_v22 }
0x118c   :  { %4487 = vmatpush3.bf16.msra.mxu0 %v4484_v22 }
0x118d   :  { %4490 = vmatprep.subr.msk.bf16.mxu0 %vm5057_vm1, %v4488_v21 }
0x1190   :  { %v4809_v23 = vpop.eup %4808 }
0x1191   :  { %v2259_v25 = vsel %vm287_vm0, %v4809_v23, 0.0  ;;  %v4811_v26 = vpop.eup %4810 }
0x1192   :  { %2260 = vadd.xlane.f32.xlu1 %v2259_v25  ;;  %v2256_v15 = vsel %vm287_vm0, %v4811_v26, 0.0 }
0x1196   :  { %2257 = vadd.xlane.f32.xlu1 %v2256_v15 }
0x11a7   :  { %2367 = vrot.lane.b32.xlu1 %v5264_v28, %s4967_s27 }
0x121f   :  { %v2261_v54 = vpop.xlane.xlu1 %2260 }
0x1220   :  { %4812 = vrcp.f32 %v2261_v54 }
0x1223   :  { %v2258_v24 = vpop.xlane.xlu1 %2257 }
0x1224   :  { %4814 = vrcp.f32 %v2258_v24 }
0x1227   :  { %v2368_v37 = vpop.permute.xlu1 %2367 }
0x122a   :  { %v4813_v34 = vpop.eup %4812 }
0x122b   :  { %v2265_v36 = vmul.f32 %v4813_v34, %v4809_v23 }
0x122e   :  { %v4815_v4 = vpop.eup %4814 }
0x122f   :  { %v2264_v35 = vmul.f32 %v4815_v4, %v4811_v26 }
0x1231   :  { %4199 = vmatprep.mubr.msk.f32.mxu0 %vm287_vm0, %v2264_v35 }
0x1232   :  { %4200 = vmatmul.mubr.msk.f32.vlgmr.msra.gmra.mrb[20].mxu0 %vm287_vm0, %v2265_v36 }
0x1233   :  { %4493 = vmatpush3.bf16.xpose.msk.msra.mxu0 %vm5057_vm1, %v4488_v21  ;;  %4206 = vmatprep.mubr.msk.f32.mxu0 %vm287_vm0, %v2366_v33 }
0x123a   :  { %4207 = vmatmul.mubr.msk.f32.vlgmr.msra.gmra.mrb[22].mxu0 %vm287_vm0, %v2368_v37 }
0x1305   :  { %v5325_v38 = vpop.f32.mrb[20].mxu0 }
0x1306   :  { %v5327_v39 = vpop.f32.mrb[21].mxu0 }
0x130d   :  { %v4208_v40 = vpop.f32.mrb[22].mxu0 }
0x130e   :  { %v2447_v41 = vpop.f32.mrb[23].mxu0  ;;  %v2459_v42 = vsel %vm287_vm0, %v4208_v40, -inf }
0x130f   :  { %2460 = vmax.xlane.f32.xlu0 %v2459_v42  ;;  %v2456_v43 = vsel %vm287_vm0, %v2447_v41, -inf }
0x1310   :  { %2457 = vmax.xlane.f32.xlu1 %v2456_v43 }
0x1321   :  { %4682 = vrot.lane.b32.xlu1 %v5077_v29, %s4967_s27 }
0x1325   :  { %2575 = vrot.lane.b32.xlu1 %v5277_v30, %s4968_s28 }
0x1329   :  { %2577 = vrot.lane.b32.xlu1 %v5264_v28, %s4968_s28 }
0x139c   :  { %v2461_v44 = vpop.xlane.xlu0 %2460 }
0x139d   :  { %v2463_v0 = vsub.f32 %v4208_v40, %v2461_v44  ;;  %v2458_v47 = vpop.xlane.xlu1 %2457 }
0x139e   :  { %v2462_v49 = vsub.f32 %v2447_v41, %v2458_v47 }
0x139f   :  { %v2466_v50 = vmul.f32 1.442695, %v2463_v0 }
0x13a0   :  { %v2464_v51 = vmul.f32 1.442695, %v2462_v49 }
0x13a1   :  { %4816 = vpow2.f32 %v2466_v50  ;;  %v4683_v52 = vpop.permute.xlu1 %4682 }
0x13a2   :  { %v4685_v53 = vunpack.i.h.bf16 %v4683_v52  ;;  %v4684_v55 = vunpack.i.l.bf16 %v4683_v52  ;;  %4818 = vpow2.f32 %v2464_v51 }
0x13a4   :  { %v4494_v57 = vpack.c.bf16 %v4685_v53, %v4684_v55 }
0x13a5   :  { %v2576_v20 = vpop.permute.xlu1 %2575 }
0x13a6   :  { %4495 = vmatprep.subr.bf16.mxu1 %v4494_v57 }
0x13a7   :  { %4497 = vmatpush3.bf16.msra.mxu1 %v4494_v57 }
0x13a9   :  { %v2578_v22 = vpop.permute.xlu1 %2577 }
0x13ab   :  { %v4817_v58 = vpop.eup %4816 }
0x13ac   :  { %v2471_v59 = vsel %vm287_vm0, %v4817_v58, 0.0  ;;  %v4819_v60 = vpop.eup %4818 }
0x13ad   :  { %2472 = vadd.xlane.f32.xlu0 %v2471_v59  ;;  %v2468_v61 = vsel %vm287_vm0, %v4819_v60, 0.0 }
0x13b1   :  { %2469 = vadd.xlane.f32.xlu0 %v2468_v61 }
0x13c7   :  { %4687 = vrot.lane.b32.xlu0 %v5109_v3, %s4968_s28 }
0x143a   :  { %v2473_v62 = vpop.xlane.xlu0 %2472 }
0x143b   :  { %4820 = vrcp.f32 %v2473_v62 }
0x143e   :  { %v2470_v27 = vpop.xlane.xlu0 %2469 }
0x143f   :  { %4822 = vrcp.f32 %v2470_v27 }
0x1442   :  { %v4688_v48 = vpop.permute.xlu0 %4687 }
0x1443   :  { %v4690_v8 = vunpack.i.h.bf16 %v4688_v48  ;;  %v4689_v9 = vunpack.i.l.bf16 %v4688_v48 }
0x1445   :  { %v4498_v56 = vpack.c.bf16 %v4690_v8, %v4689_v9  ;;  %v4821_v10 = vpop.eup %4820 }
0x1446   :  { %v2477_v13 = vmul.f32 %v4821_v10, %v4817_v58 }
0x1447   :  { %4500 = vmatprep.subr.msk.bf16.mxu1 %vm5057_vm1, %v4498_v56 }
0x1449   :  { %v4823_v11 = vpop.eup %4822 }
0x144a   :  { %v2476_v12 = vmul.f32 %v4823_v11, %v4819_v60 }
0x144c   :  { %4213 = vmatprep.mubr.msk.f32.mxu1 %vm287_vm0, %v2476_v12 }
0x144d   :  { %4214 = vmatmul.mubr.msk.f32.vlgmr.msra.gmra.mrb[30].mxu1 %vm287_vm0, %v2477_v13 }
0x144e   :  { %4503 = vmatpush3.bf16.xpose.msk.msra.mxu1 %vm5057_vm1, %v4498_v56  ;;  %4220 = vmatprep.mubr.msk.f32.mxu1 %vm287_vm0, %v2576_v20 }
0x1455   :  { %4221 = vmatmul.mubr.msk.f32.vlgmr.msra.gmra.mrb[32].mxu1 %vm287_vm0, %v2578_v22 }
0x1520   :  { %v5349_v21 = vpop.f32.mrb[30].mxu1 }
0x1521   :  { %v5351_v23 = vpop.f32.mrb[31].mxu1 }
0x1528   :  { %v4222_v25 = vpop.f32.mrb[32].mxu1 }
0x1529   :  { %v2657_v26 = vpop.f32.mrb[33].mxu1  ;;  %v2669_v15 = vsel %vm287_vm0, %v4222_v25, -inf }
0x152a   :  { %2670 = vmax.xlane.f32.xlu0 %v2669_v15  ;;  %v2666_v33 = vsel %vm287_vm0, %v2657_v26, -inf }
0x152b   :  { %2667 = vmax.xlane.f32.xlu1 %v2666_v33 }
0x153c   :  { %4692 = vrot.lane.b32.xlu1 %v5077_v29, %s4968_s28 }
0x1540   :  { %2785 = vrot.lane.b32.xlu1 %v5277_v30, %s4969_s29 }
0x1544   :  { %2787 = vrot.lane.b32.xlu1 %v5264_v28, %s4969_s29 }
0x15b7   :  { %v2671_v54 = vpop.xlane.xlu0 %2670 }
0x15b8   :  { %v2673_v24 = vsub.f32 %v4222_v25, %v2671_v54  ;;  %v2668_v34 = vpop.xlane.xlu1 %2667 }
0x15b9   :  { %v2672_v4 = vsub.f32 %v2657_v26, %v2668_v34 }
0x15ba   :  { %v2676_v35 = vmul.f32 1.442695, %v2673_v24 }
0x15bb   :  { %v2674_v36 = vmul.f32 1.442695, %v2672_v4 }
0x15bc   :  { %4824 = vpow2.f32 %v2676_v35  ;;  %v4693_v37 = vpop.permute.xlu1 %4692 }
0x15bd   :  { %v4695_v40 = vunpack.i.h.bf16 %v4693_v37  ;;  %v4694_v41 = vunpack.i.l.bf16 %v4693_v37  ;;  %4826 = vpow2.f32 %v2674_v36 }
0x15bf   :  { %v4504_v42 = vpack.c.bf16 %v4695_v40, %v4694_v41 }
0x15c0   :  { %v2786_v61 = vpop.permute.xlu1 %2785 }
0x15c1   :  { %4505 = vmatprep.subr.bf16.mxu0 %v4504_v42 }
0x15c2   :  { %4507 = vmatpush3.bf16.msra.mxu0 %v4504_v42 }
0x15c4   :  { %v2788_v62 = vpop.permute.xlu1 %2787 }
0x15c6   :  { %v4825_v43 = vpop.eup %4824 }
0x15c7   :  { %v2681_v44 = vsel %vm287_vm0, %v4825_v43, 0.0  ;;  %v4827_v0 = vpop.eup %4826 }
0x15c8   :  { %2682 = vadd.xlane.f32.xlu0 %v2681_v44  ;;  %v2678_v47 = vsel %vm287_vm0, %v4827_v0, 0.0 }
0x15cc   :  { %2679 = vadd.xlane.f32.xlu0 %v2678_v47 }
0x15e2   :  { %4697 = vrot.lane.b32.xlu0 %v5109_v3, %s4969_s29 }
0x1655   :  { %v2683_v49 = vpop.xlane.xlu0 %2682 }
0x1656   :  { %4828 = vrcp.f32 %v2683_v49 }
0x1659   :  { %v2680_v50 = vpop.xlane.xlu0 %2679 }
0x165a   :  { %4830 = vrcp.f32 %v2680_v50 }
0x165d   :  { %v4698_v51 = vpop.permute.xlu0 %4697 }
0x165e   :  { %v4700_v52 = vunpack.i.h.bf16 %v4698_v51  ;;  %v4699_v53 = vunpack.i.l.bf16 %v4698_v51 }
0x1660   :  { %v4508_v55 = vpack.c.bf16 %v4700_v52, %v4699_v53  ;;  %v4829_v57 = vpop.eup %4828 }
0x1661   :  { %v2687_v60 = vmul.f32 %v4829_v57, %v4825_v43 }
0x1662   :  { %4510 = vmatprep.subr.msk.bf16.mxu0 %vm5057_vm1, %v4508_v55 }
0x1664   :  { %v4831_v58 = vpop.eup %4830 }
0x1665   :  { %v2686_v59 = vmul.f32 %v4831_v58, %v4827_v0 }
0x1667   :  { %4227 = vmatprep.mubr.msk.f32.mxu0 %vm287_vm0, %v2686_v59 }
0x1668   :  { %4228 = vmatmul.mubr.msk.f32.vlgmr.msra.gmra.mrb[24].mxu0 %vm287_vm0, %v2687_v60 }
0x1669   :  { %4513 = vmatpush3.bf16.xpose.msk.msra.mxu0 %vm5057_vm1, %v4508_v55  ;;  %4234 = vmatprep.mubr.msk.f32.mxu0 %vm287_vm0, %v2786_v61 }
0x1670   :  { %4235 = vmatmul.mubr.msk.f32.vlgmr.msra.gmra.mrb[26].mxu0 %vm287_vm0, %v2788_v62 }
0x173b   :  { %v5373_v27 = vpop.f32.mrb[24].mxu0 }
0x173c   :  { %v5375_v48 = vpop.f32.mrb[25].mxu0 }
0x1743   :  { %v4236_v8 = vpop.f32.mrb[26].mxu0 }
0x1744   :  { %v2867_v9 = vpop.f32.mrb[27].mxu0  ;;  %v2879_v56 = vsel %vm287_vm0, %v4236_v8, -inf }
0x1745   :  { %2880 = vmax.xlane.f32.xlu0 %v2879_v56  ;;  %v2876_v10 = vsel %vm287_vm0, %v2867_v9, -inf }
0x1746   :  { %2877 = vmax.xlane.f32.xlu1 %v2876_v10 }
0x1757   :  { %4702 = vrot.lane.b32.xlu1 %v5077_v29, %s4969_s29 }
0x175b   :  { %2995 = vrot.lane.b32.xlu1 %v5277_v30, %s4970_s30 }
0x175f   :  { %2997 = vrot.lane.b32.xlu1 %v5264_v28, %s4970_s30 }
0x17d2   :  { %v2881_v11 = vpop.xlane.xlu0 %2880 }
0x17d3   :  { %v2883_v12 = vsub.f32 %v4236_v8, %v2881_v11  ;;  %v2878_v13 = vpop.xlane.xlu1 %2877 }
0x17d4   :  { %v2882_v20 = vsub.f32 %v2867_v9, %v2878_v13 }
0x17d5   :  { %v2886_v22 = vmul.f32 1.442695, %v2883_v12 }
0x17d6   :  { %v2884_v25 = vmul.f32 1.442695, %v2882_v20 }
0x17d7   :  { %4832 = vpow2.f32 %v2886_v22  ;;  %v4703_v26 = vpop.permute.xlu1 %4702 }
0x17d8   :  { %v4705_v15 = vunpack.i.h.bf16 %v4703_v26  ;;  %v4704_v33 = vunpack.i.l.bf16 %v4703_v26  ;;  %4834 = vpow2.f32 %v2884_v25 }
0x17da   :  { %v4514_v54 = vpack.c.bf16 %v4705_v15, %v4704_v33 }
0x17db   :  { %v2996_v50 = vpop.permute.xlu1 %2995 }
0x17dc   :  { %4515 = vmatprep.subr.bf16.mxu1 %v4514_v54 }
0x17dd   :  { %4517 = vmatpush3.bf16.msra.mxu1 %v4514_v54 }
0x17df   :  { %v2998_v51 = vpop.permute.xlu1 %2997 }
0x17e1   :  { %v4833_v24 = vpop.eup %4832 }
0x17e2   :  { %v2891_v34 = vsel %vm287_vm0, %v4833_v24, 0.0  ;;  %v4835_v4 = vpop.eup %4834 }
0x17e3   :  { %2892 = vadd.xlane.f32.xlu0 %v2891_v34  ;;  %v2888_v35 = vsel %vm287_vm0, %v4835_v4, 0.0 }
0x17e7   :  { %2889 = vadd.xlane.f32.xlu0 %v2888_v35 }
0x17fd   :  { %4707 = vrot.lane.b32.xlu0 %v5109_v3, %s4970_s30 }
0x1870   :  { %v2893_v36 = vpop.xlane.xlu0 %2892 }
0x1871   :  { %4836 = vrcp.f32 %v2893_v36 }
0x1874   :  { %v2890_v37 = vpop.xlane.xlu0 %2889 }
0x1875   :  { %4838 = vrcp.f32 %v2890_v37 }
0x1878   :  { %v4708_v40 = vpop.permute.xlu0 %4707 }
0x1879   :  { %v4710_v41 = vunpack.i.h.bf16 %v4708_v40  ;;  %v4709_v42 = vunpack.i.l.bf16 %v4708_v40 }
0x187b   :  { %v4518_v43 = vpack.c.bf16 %v4710_v41, %v4709_v42  ;;  %v4837_v44 = vpop.eup %4836 }
0x187c   :  { %v2897_v49 = vmul.f32 %v4837_v44, %v4833_v24 }
0x187d   :  { %4520 = vmatprep.subr.msk.bf16.mxu1 %vm5057_vm1, %v4518_v43 }
0x187f   :  { %v4839_v0 = vpop.eup %4838 }
0x1880   :  { %v2896_v47 = vmul.f32 %v4839_v0, %v4835_v4 }
0x1882   :  { %4241 = vmatprep.mubr.msk.f32.mxu1 %vm287_vm0, %v2896_v47 }
0x1883   :  { %4242 = vmatmul.mubr.msk.f32.vlgmr.msra.gmra.mrb[34].mxu1 %vm287_vm0, %v2897_v49 }
0x1884   :  { %4523 = vmatpush3.bf16.xpose.msk.msra.mxu1 %vm5057_vm1, %v4518_v43  ;;  %4248 = vmatprep.mubr.msk.f32.mxu1 %vm287_vm0, %v2996_v50 }
0x188b   :  { %4249 = vmatmul.mubr.msk.f32.vlgmr.msra.gmra.mrb[36].mxu1 %vm287_vm0, %v2998_v51 }
0x1956   :  { %v5397_v52 = vpop.f32.mrb[34].mxu1 }
0x1957   :  { %v5399_v53 = vpop.f32.mrb[35].mxu1 }
0x195e   :  { %v4250_v55 = vpop.f32.mrb[36].mxu1 }
0x195f   :  { %v3077_v57 = vpop.f32.mrb[37].mxu1  ;;  %v3089_v58 = vsel %vm287_vm0, %v4250_v55, -inf }
0x1960   :  { %3090 = vmax.xlane.f32.xlu0 %v3089_v58  ;;  %v3086_v59 = vsel %vm287_vm0, %v3077_v57, -inf }
0x1961   :  { %3087 = vmax.xlane.f32.xlu1 %v3086_v59 }
0x1972   :  { %4712 = vrot.lane.b32.xlu1 %v5077_v29, %s4970_s30 }
0x1976   :  { %3205 = vrot.lane.b32.xlu1 %v5277_v30, %s4971_s5 }
0x197a   :  { %3207 = vrot.lane.b32.xlu1 %v5264_v28, %s4971_s5 }
0x19ed   :  { %v3091_v60 = vpop.xlane.xlu0 %3090 }
0x19ee   :  { %v3093_v61 = vsub.f32 %v4250_v55, %v3091_v60  ;;  %v3088_v62 = vpop.xlane.xlu1 %3087 }
0x19ef   :  { %v3092_v8 = vsub.f32 %v3077_v57, %v3088_v62 }
0x19f0   :  { %v3096_v9 = vmul.f32 1.442695, %v3093_v61 }
0x19f1   :  { %v3094_v56 = vmul.f32 1.442695, %v3092_v8 }
0x19f2   :  { %4840 = vpow2.f32 %v3096_v9  ;;  %v4713_v10 = vpop.permute.xlu1 %4712 }
0x19f3   :  { %v4715_v11 = vunpack.i.h.bf16 %v4713_v10  ;;  %v4714_v12 = vunpack.i.l.bf16 %v4713_v10  ;;  %4842 = vpow2.f32 %v3094_v56 }
0x19f5   :  { %v4524_v13 = vpack.c.bf16 %v4715_v11, %v4714_v12 }
0x19f6   :  { %v3206_v41 = vpop.permute.xlu1 %3205 }
0x19f7   :  { %4525 = vmatprep.subr.bf16.mxu0 %v4524_v13 }
0x19f8   :  { %4527 = vmatpush3.bf16.msra.mxu0 %v4524_v13 }
0x19fa   :  { %v3208_v42 = vpop.permute.xlu1 %3207 }
0x19fc   :  { %v4841_v20 = vpop.eup %4840 }
0x19fd   :  { %v3101_v22 = vsel %vm287_vm0, %v4841_v20, 0.0  ;;  %v4843_v25 = vpop.eup %4842 }
0x19fe   :  { %3102 = vadd.xlane.f32.xlu0 %v3101_v22  ;;  %v3098_v26 = vsel %vm287_vm0, %v4843_v25, 0.0 }
0x1a02   :  { %3099 = vadd.xlane.f32.xlu0 %v3098_v26 }
0x1a18   :  { %4717 = vrot.lane.b32.xlu0 %v5109_v3, %s4971_s5 }
0x1a8b   :  { %v3103_v15 = vpop.xlane.xlu0 %3102 }
0x1a8c   :  { %4844 = vrcp.f32 %v3103_v15 }
0x1a8f   :  { %v3100_v33 = vpop.xlane.xlu0 %3099 }
0x1a90   :  { %4846 = vrcp.f32 %v3100_v33 }
0x1a93   :  { %v4718_v54 = vpop.permute.xlu0 %4717 }
0x1a94   :  { %v4720_v24 = vunpack.i.h.bf16 %v4718_v54  ;;  %v4719_v34 = vunpack.i.l.bf16 %v4718_v54 }
0x1a96   :  { %v4528_v4 = vpack.c.bf16 %v4720_v24, %v4719_v34  ;;  %v4845_v35 = vpop.eup %4844 }
0x1a97   :  { %v3107_v40 = vmul.f32 %v4845_v35, %v4841_v20 }
0x1a98   :  { %4530 = vmatprep.subr.msk.bf16.mxu0 %vm5057_vm1, %v4528_v4 }
0x1a9a   :  { %v4847_v36 = vpop.eup %4846 }
0x1a9b   :  { %v3106_v37 = vmul.f32 %v4847_v36, %v4843_v25 }
0x1a9d   :  { %4255 = vmatprep.mubr.msk.f32.mxu0 %vm287_vm0, %v3106_v37 }
0x1a9e   :  { %4256 = vmatmul.mubr.msk.f32.vlgmr.msra.gmra.mrb[28].mxu0 %vm287_vm0, %v3107_v40 }
0x1a9f   :  { %4533 = vmatpush3.bf16.xpose.msk.msra.mxu0 %vm5057_vm1, %v4528_v4  ;;  %4262 = vmatprep.mubr.msk.f32.mxu0 %vm287_vm0, %v3206_v41 }
0x1aa6   :  { %4263 = vmatmul.mubr.msk.f32.vlgmr.msra.gmra.mrb[30].mxu0 %vm287_vm0, %v3208_v42 }
0x1b71   :  { %v5421_v43 = vpop.f32.mrb[28].mxu0 }
0x1b72   :  { %v5423_v44 = vpop.f32.mrb[29].mxu0 }
0x1b79   :  { %v4264_v0 = vpop.f32.mrb[30].mxu0 }
0x1b7a   :  { %v3287_v47 = vpop.f32.mrb[31].mxu0  ;;  %v3299_v49 = vsel %vm287_vm0, %v4264_v0, -inf }
0x1b7b   :  { %3300 = vmax.xlane.f32.xlu0 %v3299_v49  ;;  %v3296_v50 = vsel %vm287_vm0, %v3287_v47, -inf }
0x1b7c   :  { %3297 = vmax.xlane.f32.xlu1 %v3296_v50 }
0x1b8d   :  { %4722 = vrot.lane.b32.xlu1 %v5077_v29, %s4971_s5 }
0x1b91   :  { %3415 = vrot.lane.b32.xlu1 %v5277_v30, %s4972_s6 }
0x1b95   :  { %3417 = vrot.lane.b32.xlu1 %v5264_v28, %s4972_s6 }
0x1c08   :  { %v3301_v51 = vpop.xlane.xlu0 %3300 }
0x1c09   :  { %v3303_v55 = vsub.f32 %v4264_v0, %v3301_v51  ;;  %v3298_v57 = vpop.xlane.xlu1 %3297 }
0x1c0a   :  { %v3302_v58 = vsub.f32 %v3287_v47, %v3298_v57 }
0x1c0b   :  { %v3306_v59 = vmul.f32 1.442695, %v3303_v55 }
0x1c0c   :  { %v3304_v60 = vmul.f32 1.442695, %v3302_v58  ;;  %v3629_v58 = vld [vmem:[#allocation8] sm:$0xff] }
0x1c0d   :  { %4848 = vpow2.f32 %v3306_v59  ;;  %v4723_v61 = vpop.permute.xlu1 %4722  ;;  %v3630_v59 = vld [vmem:[#allocation8 + $0x8] sm:$0xff] }
0x1c0e   :  { %v4725_v62 = vunpack.i.h.bf16 %v4723_v61  ;;  %v4724_v8 = vunpack.i.l.bf16 %v4723_v61  ;;  %4850 = vpow2.f32 %v3304_v60  ;;  %v4548_v60 = vpack.c.bf16 %v3630_v59, %v3629_v58 }
0x1c10   :  { %v4534_v9 = vpack.c.bf16 %v4725_v62, %v4724_v8  ;;  %v3633_v62 = vld [vmem:[#allocation8 + $0x20] sm:$0xff]  ;;  %v3634_v8 = vld [vmem:[#allocation8 + $0x28] sm:$0xff] }
0x1c11   :  { %v3416_v24 = vpop.permute.xlu1 %3415 }
0x1c12   :  { %4535 = vmatprep.subr.bf16.mxu1 %v4534_v9 }
0x1c13   :  { %4537 = vmatpush3.bf16.msra.mxu1 %v4534_v9 }
0x1c17   :  { %v4849_v56 = vpop.eup %4848 }
0x1c18   :  { %v3311_v30 = vsel %vm287_vm0, %v4849_v56, 0.0  ;;  %v4851_v10 = vpop.eup %4850 }
0x1c19   :  { %3312 = vadd.xlane.f32.xlu0 %v3311_v30  ;;  %v3308_v28 = vsel %vm287_vm0, %v4851_v10, 0.0  ;;  %v3635_v30 = vld [vmem:[#allocation8 + $0x30] sm:$0xff] }
0x1c1d   :  { %3309 = vadd.xlane.f32.xlu0 %v3308_v28 }
0x1c33   :  { %4727 = vrot.lane.b32.xlu0 %v5109_v3, %s4972_s6  ;;  %v3418_v3 = vpop.permute.xlu1 %3417 }
0x1ca6   :  { %v3313_v11 = vpop.xlane.xlu0 %3312 }
0x1ca7   :  { %4852 = vrcp.f32 %v3313_v11 }
0x1caa   :  { %v3310_v12 = vpop.xlane.xlu0 %3309 }
0x1cab   :  { %4854 = vrcp.f32 %v3310_v12 }
0x1cae   :  { %v4728_v13 = vpop.permute.xlu0 %4727 }
0x1caf   :  { %v4730_v20 = vunpack.i.h.bf16 %v4728_v13  ;;  %v4729_v22 = vunpack.i.l.bf16 %v4728_v13  ;;  %v3637_v13 = vld [vmem:[#allocation8 + $0x40] sm:$0xff] }
0x1cb1   :  { %v4538_v25 = vpack.c.bf16 %v4730_v20, %v4729_v22  ;;  %v4853_v26 = vpop.eup %4852  ;;  %v3638_v20 = vld [vmem:[#allocation8 + $0x48] sm:$0xff] }
0x1cb2   :  { %v3317_v54 = vmul.f32 %v4853_v26, %v4849_v56  ;;  %v4556_v56 = vpack.c.bf16 %v3634_v8, %v3633_v62  ;;  %v4564_v26 = vpack.c.bf16 %v3638_v20, %v3637_v13 }
0x1cb3   :  { %4540 = vmatprep.subr.msk.bf16.mxu1 %vm5057_vm1, %v4538_v25 }
0x1cb5   :  { %v4855_v15 = vpop.eup %4854 }
0x1cb6   :  { %v3316_v33 = vmul.f32 %v4855_v15, %v4851_v10  ;;  %v3636_v10 = vld [vmem:[#allocation8 + $0x38] sm:$0xff]  ;;  %v3639_v15 = vld [vmem:[#allocation8 + $0x50] sm:$0xff] }
0x1cb7   :  { %v4560_v12 = vpack.c.bf16 %v3636_v10, %v3635_v30 }
0x1cb8   :  { %4269 = vmatprep.mubr.msk.f32.mxu1 %vm287_vm0, %v3316_v33  ;;  %v3640_v33 = vld [vmem:[#allocation8 + $0x58] sm:$0xff] }
0x1cb9   :  { %4270 = vmatmul.mubr.msk.f32.vlgmr.msra.gmra.mrb[38].mxu1 %vm287_vm0, %v3317_v54 }
0x1cba   :  { %4543 = vmatpush3.bf16.xpose.msk.msra.mxu1 %vm5057_vm1, %v4538_v25  ;;  %4276 = vmatprep.mubr.msk.f32.mxu1 %vm287_vm0, %v3416_v24 }
0x1cc1   :  { %4277 = vmatmul.mubr.msk.f32.vlgmr.msra.gmra.mrb[40].mxu1 %vm287_vm0, %v3418_v3  ;;  %v4568_v3 = vpack.c.bf16 %v3640_v33, %v3639_v15 }
0x1d8c   :  { %v4271_v34 = vpop.f32.mrb[38].mxu1 }
0x1d8d   :  { %v5445_v4 = vpop.f32.mrb[39].mxu1 }
0x1d94   :  { %v4278_v35 = vpop.f32.mrb[40].mxu1 }
0x1d95   :  { %v3497_v36 = vpop.f32.mrb[41].mxu1  ;;  %v3509_v37 = vsel %vm287_vm0, %v4278_v35, -inf }
0x1d96   :  { %v3506_v40 = vsel %vm287_vm0, %v3497_v36, -inf  ;;  %3510 = vmax.xlane.f32.xlu0 %v3509_v37 }
0x1d97   :  { %3507 = vmax.xlane.f32.xlu1 %v3506_v40  ;;  %v3643_v40 = vld [vmem:[#allocation8 + $0x70] sm:$0xff] }
0x1da8   :  { %4732 = vrot.lane.b32.xlu1 %v5077_v29, %s4972_s6 }
0x1dac   :  { %686 = vrot.lane.b32.xlu1 %v5155_v14, %s4972_s6 }
0x1db0   :  { %895 = vrot.lane.b32.xlu1 %v5161_v18, %s4971_s5 }
0x1db4   :  { %897 = vrot.lane.b32.xlu1 %v5159_v17, %s4971_s5 }
0x1db8   :  { %1108 = vrot.lane.b32.xlu1 %v5223_v63, %s4970_s30 }
0x1dbc   :  { %1319 = vrot.lane.b32.xlu1 %v5193_v6, %s4969_s29 }
0x1dc0   :  { %2357 = vrot.lane.b32.xlu1 %v5327_v39, %s4972_s6 }
0x1dc4   :  { %1739 = vrot.lane.b32.xlu1 %v5255_v46, %s4967_s27 }
0x1dc8   :  { %2567 = vrot.lane.b32.xlu1 %v5351_v23, %s4971_s5 }
0x1dcc   :  { %1950 = vrot.lane.b32.xlu1 %v5289_v32, %s4966_s2 }
0x1dd0   :  { %2777 = vrot.lane.b32.xlu1 %v5375_v48, %s4970_s30 }
0x1dd4   :  { %2779 = vrot.lane.b32.xlu1 %v5373_v27, %s4970_s30 }
0x1dd8   :  { %2989 = vrot.lane.b32.xlu1 %v5397_v52, %s4969_s29 }
0x1ddc   :  { %3199 = vrot.lane.b32.xlu1 %v5421_v43, %s4968_s28 }
0x1de0   :  { %3409 = vrot.lane.b32.xlu1 %v4271_v34, %s4967_s27  ;;  %v3641_v34 = vld [vmem:[#allocation8 + $0x60] sm:$0xff] }
0x1e23   :  { %v3511_v19 = vpop.xlane.xlu0 %3510 }
0x1e24   :  { %v3513_v29 = vsub.f32 %v4278_v35, %v3511_v19  ;;  %v3508_v14 = vpop.xlane.xlu1 %3507  ;;  %v3644_v19 = vld [vmem:[#allocation8 + $0x78] sm:$0xff] }
0x1e25   :  { %v3512_v17 = vsub.f32 %v3497_v36, %v3508_v14 }
0x1e26   :  { %v3516_v18 = vmul.f32 1.442695, %v3513_v29 }
0x1e27   :  { %v3514_v6 = vmul.f32 1.442695, %v3512_v17  ;;  %v4576_v17 = vpack.c.bf16 %v3644_v19, %v3643_v40 }
0x1e28   :  { %v4733_v63 = vpop.permute.xlu1 %4732 }
0x1e29   :  { %4856 = vpow2.f32 %v3514_v6  ;;  %v4735_v46 = vunpack.i.h.bf16 %v4733_v63  ;;  %v4734_v32 = vunpack.i.l.bf16 %v4733_v63 }
0x1e2a   :  { %4858 = vpow2.f32 %v3516_v18 }
0x1e2b   :  { %v4544_v39 = vpack.c.bf16 %v4735_v46, %v4734_v32 }
0x1e2c   :  { %v687_v23 = vpop.permute.xlu1 %686 }
0x1e2d   :  { %692 = vst.msk [vmem:[#allocation2 + $0x8] sm:$0xff] %vm690_vm2, %v687_v23  ;;  %4545 = vmatprep.subr.bf16.mxu0 %v4544_v39  ;;  %v3855_v23 = vld [vmem:[%s5557_s3] ss:$0 sm:$0xff]  ;;  %s4930_s3 = scalar_lea.vmem %s3747_s10, 512 }
0x1e2e   :  { %4547 = vmatpush3.bf16.msra.mxu0 %v4544_v39  ;;  %p4931_p10 = scmp.ne.s32.totalorder %s3747_s10, %s4930_s3  ;;  %p4936_p12 = scmp.lt.s32.totalorder %s4930_s3, %s4930_s3 }
0x1e2f   :  { %4549 = vmatprep.subr.bf16.mxu0 %v4548_v60 }
0x1e30   :  { %v896_v27 = vpop.permute.xlu1 %895  ;;  %p4937_p13 = por %p4936_p12, %p4935_p11 }
0x1e32   :  { %p4938_p0 = pnand %p4937_p13, %p4931_p10 }
0x1e33   :  { %v4857_v48 = vpop.eup %4856 }
0x1e34   :  { %v898_v52 = vpop.permute.xlu1 %897  ;;  %v3518_v41 = vsel %vm287_vm0, %v4857_v48, 0.0  ;;  %v4859_v42 = vpop.eup %4858 }
0x1e35   :  { %903 = vst.msk [vmem:[#allocation2 + $0x8] sm:$0xff] %vm901_vm3, %v898_v52  ;;  %3519 = vadd.xlane.f32.xlu0 %v3518_v41  ;;  %v3521_v0 = vsel %vm287_vm0, %v4859_v42, 0.0 }
0x1e38   :  { %v1109_v43 = vpop.permute.xlu1 %1108 }
0x1e39   :  { %1114 = vst.msk [vmem:[#allocation2 + $0x8] sm:$0xff] %vm1112_vm4, %v1109_v43  ;;  %3522 = vadd.xlane.f32.xlu0 %v3521_v0 }
0x1e3c   :  { %v1320_v47 = vpop.permute.xlu1 %1319 }
0x1e3d   :  { %1325 = vst.msk [vmem:[#allocation2 + $0x8] sm:$0xff] %vm1323_vm5, %v1320_v47 }
0x1e40   :  { %v2358_v49 = vpop.permute.xlu1 %2357 }
0x1e41   :  { %2363 = vst.msk [vmem:[#allocation2 + $0x10] sm:$0xff] %vm690_vm2, %v2358_v49 }
0x1e44   :  { %v1740_v50 = vpop.permute.xlu1 %1739 }
0x1e48   :  { %v2568_v51 = vpop.permute.xlu1 %2567 }
0x1e49   :  { %2573 = vst.msk [vmem:[#allocation2 + $0x10] sm:$0xff] %vm901_vm3, %v2568_v51 }
0x1e4c   :  { %v1951_v55 = vpop.permute.xlu1 %1950 }
0x1e4f   :  { %684 = vrot.lane.b32.xlu0 %v5157_v16, %s4972_s6 }
0x1e50   :  { %v2778_v57 = vpop.permute.xlu1 %2777 }
0x1e51   :  { %2783 = vst.msk [vmem:[#allocation2 + $0x10] sm:$0xff] %vm1112_vm4, %v2778_v57 }
0x1e53   :  { %1106 = vrot.lane.b32.xlu0 %v5225_v1, %s4970_s30 }
0x1e54   :  { %v2780_v28 = vpop.permute.xlu1 %2779 }
0x1e57   :  { %1317 = vrot.lane.b32.xlu0 %v5195_v7, %s4969_s29 }
0x1e58   :  { %v2990_v22 = vpop.permute.xlu1 %2989 }
0x1e5b   :  { %1528 = vrot.lane.b32.xlu0 %v5229_v5, %s4968_s28 }
0x1e5c   :  { %v3200_v35 = vpop.permute.xlu1 %3199 }
0x1e5f   :  { %1530 = vrot.lane.b32.xlu0 %v5227_v2, %s4968_s28 }
0x1e60   :  { %v3410_v29 = vpop.permute.xlu1 %3409 }
0x1e63   :  { %2359 = vrot.lane.b32.xlu0 %v5325_v38, %s4972_s6  ;;  %v3632_v38 = vld [vmem:[#allocation8 + $0x18] sm:$0xff] }
0x1e67   :  { %1741 = vrot.lane.b32.xlu0 %v5253_v45, %s4967_s27 }
0x1e6b   :  { %2569 = vrot.lane.b32.xlu0 %v5349_v21, %s4971_s5 }
0x1e6f   :  { %1952 = vrot.lane.b32.xlu0 %v5287_v31, %s4966_s2  ;;  %v3631_v31 = vld [vmem:[#allocation8 + $0x10] sm:$0xff] }
0x1e70   :  { %v4552_v61 = vpack.c.bf16 %v3632_v38, %v3631_v31 }
0x1e73   :  { %2987 = vrot.lane.b32.xlu0 %v5399_v53, %s4969_s29 }
0x1e77   :  { %3197 = vrot.lane.b32.xlu0 %v5423_v44, %s4968_s28 }
0x1e7b   :  { %3407 = vrot.lane.b32.xlu0 %v5445_v4, %s4967_s27  ;;  %v3642_v4 = vld [vmem:[#allocation8 + $0x68] sm:$0xff] }
0x1e7c   :  { %v4572_v37 = vpack.c.bf16 %v3642_v4, %v3641_v34 }
0x1ec2   :  { %v3520_v16 = vpop.xlane.xlu0 %3519 }
0x1ec3   :  { %4860 = vrcp.f32 %v3520_v16 }
0x1ec6   :  { %v3523_v7 = vpop.xlane.xlu0 %3522 }
0x1ec7   :  { %4862 = vrcp.f32 %v3523_v7 }
0x1eca   :  { %v685_v1 = vpop.permute.xlu0 %684 }
0x1ecb   :  { %691 = vst.msk [vmem:[#allocation2] sm:$0xff] %vm690_vm2, %v685_v1 }
0x1ecc   :  { %902 = vst.msk [vmem:[#allocation2] sm:$0xff] %vm901_vm3, %v896_v27 }
0x1ecd   :  { %v4861_v2 = vpop.eup %4860 }
0x1ece   :  { %v1107_v5 = vpop.permute.xlu0 %1106  ;;  %v3526_v45 = vmul.f32 %v4861_v2, %v4857_v48 }
0x1ecf   :  { %1113 = vst.msk [vmem:[#allocation2] sm:$0xff] %vm1112_vm4, %v1107_v5 }
0x1ed0   :  { %4283 = vmatprep.mubr.msk.f32.mxu0 %vm287_vm0, %v3526_v45 }
0x1ed1   :  { %v4863_v21 = vpop.eup %4862 }
0x1ed2   :  { %v3527_v53 = vmul.f32 %v4863_v21, %v4859_v42  ;;  %v1318_v44 = vpop.permute.xlu0 %1317 }
0x1ed3   :  { %1324 = vst.msk [vmem:[#allocation2] sm:$0xff] %vm1323_vm5, %v1318_v44 }
0x1ed4   :  { %4284 = vmatmul.mubr.msk.f32.vlgmr.msra.gmra.mrb[32].mxu0 %vm287_vm0, %v3527_v53 }
0x1ed5   :  { %4551 = vmatpush3.bf16.msra.mxu0 %v4548_v60 }
0x1ed6   :  { %v1529_v9 = vpop.permute.xlu0 %1528  ;;  %4553 = vmatprep.subr.bf16.mxu0 %v4552_v61 }
0x1ed7   :  { %1535 = vst.msk [vmem:[#allocation2] sm:$0xff] %vm1534_vm6, %v1529_v9 }
0x1ed8   :  { %1746 = vst.msk [vmem:[#allocation2] sm:$0xff] %vm1745_vm7, %v1740_v50 }
0x1ed9   :  { %1957 = vst.msk [vmem:[#allocation2] sm:$0xff] %vm1956_vm8, %v1951_v55  ;;  %4555 = vmatpush3.bf16.msra.mxu0 %v4552_v61 }
0x1eda   :  { %v1531_v11 = vpop.permute.xlu0 %1530  ;;  %4557 = vmatprep.subr.bf16.mxu0 %v4556_v56 }
0x1edb   :  { %1536 = vst.msk [vmem:[#allocation2 + $0x8] sm:$0xff] %vm1534_vm6, %v1531_v11 }
0x1edd   :  { %4559 = vmatpush3.bf16.msra.mxu0 %v4556_v56 }
0x1ede   :  { %v2360_v25 = vpop.permute.xlu0 %2359  ;;  %4561 = vmatprep.subr.bf16.mxu0 %v4560_v12 }
0x1edf   :  { %2364 = vst.msk [vmem:[#allocation2 + $0x18] sm:$0xff] %vm690_vm2, %v2360_v25 }
0x1ee0   :  { %v3625_v54 = vld [vmem:[#allocation2] sm:$0xff] }
0x1ee1   :  { %4563 = vmatpush3.bf16.msra.mxu0 %v4560_v12  ;;  %4318 = vmatprep.mubr.f32.mxu0 %v3625_v54 }
0x1ee2   :  { %v1742_v24 = vpop.permute.xlu0 %1741  ;;  %4565 = vmatprep.subr.bf16.mxu0 %v4564_v26 }
0x1ee3   :  { %1747 = vst.msk [vmem:[#allocation2 + $0x8] sm:$0xff] %vm1745_vm7, %v1742_v24 }
0x1ee5   :  { %4567 = vmatpush3.bf16.msra.mxu0 %v4564_v26 }
0x1ee6   :  { %v2570_v36 = vpop.permute.xlu0 %2569  ;;  %4569 = vmatprep.subr.bf16.mxu0 %v4568_v3 }
0x1ee7   :  { %2574 = vst.msk [vmem:[#allocation2 + $0x18] sm:$0xff] %vm901_vm3, %v2570_v36 }
0x1ee8   :  { %2784 = vst.msk [vmem:[#allocation2 + $0x18] sm:$0xff] %vm1112_vm4, %v2780_v28 }
0x1ee9   :  { %2994 = vst.msk [vmem:[#allocation2 + $0x18] sm:$0xff] %vm1323_vm5, %v2990_v22  ;;  %4571 = vmatpush3.bf16.msra.mxu0 %v4568_v3 }
0x1eea   :  { %3204 = vst.msk [vmem:[#allocation2 + $0x18] sm:$0xff] %vm1534_vm6, %v3200_v35  ;;  %v1953_v14 = vpop.permute.xlu0 %1952  ;;  %4573 = vmatprep.subr.bf16.mxu0 %v4572_v37 }
0x1eeb   :  { %3414 = vst.msk [vmem:[#allocation2 + $0x18] sm:$0xff] %vm1745_vm7, %v3410_v29 }
0x1eec   :  { %1958 = vst.msk [vmem:[#allocation2 + $0x8] sm:$0xff] %vm1956_vm8, %v1953_v14 }
0x1eed   :  { %4575 = vmatpush3.bf16.msra.mxu0 %v4572_v37 }
0x1eee   :  { %v2988_v18 = vpop.permute.xlu0 %2987  ;;  %4577 = vmatprep.subr.bf16.mxu0 %v4576_v17 }
0x1eef   :  { %2993 = vst.msk [vmem:[#allocation2 + $0x10] sm:$0xff] %vm1323_vm5, %v2988_v18 }
0x1ef1   :  { %4579 = vmatpush3.bf16.msra.mxu0 %v4576_v17 }
0x1ef2   :  { %v3198_v6 = vpop.permute.xlu0 %3197 }
0x1ef3   :  { %v3626_v63 = vld [vmem:[#allocation2 + $0x8] sm:$0xff]  ;;  %3203 = vst.msk [vmem:[#allocation2 + $0x10] sm:$0xff] %vm1534_vm6, %v3198_v6 }
0x1ef4   :  { %4319 = vmatmul.mubr.f32.vlgmr.msra.gmra.mrb[34].mxu0 %v3626_v63 }
0x1ef6   :  { %v3408_v46 = vpop.permute.xlu0 %3407 }
0x1ef7   :  { %3413 = vst.msk [vmem:[#allocation2 + $0x10] sm:$0xff] %vm1745_vm7, %v3408_v46 }
0x1fa7   :  { %v4285_v32 = vpop.f32.mrb[32].mxu0 }
0x1fa8   :  { %3619 = vrot.lane.b32.xlu1 %v4285_v32, %s4966_s2  ;;  %v3606_v39 = vpop.f32.mrb[33].mxu0 }
0x1fa9   :  { %3617 = vrot.lane.b32.xlu0 %v3606_v39, %s4966_s2 }
0x1fc7   :  { %v4320_v27 = vpop.f32.mrb[34].mxu0 }
0x1fc8   :  { %v3724_v48 = vadd.f32 %v4320_v27, %v3855_v23  ;;  %v3718_v52 = vpop.f32.mrb[35].mxu0 }
0x1fc9   :  { %v3719_v41 = vadd.f32 %v3855_v23, %v3718_v52 }
0x1fca   :  { %3738 = vst [vmem:[#allocation9 + $0x8] sm:$0xff] %v3724_v48 }
0x1fcb   :  { %3737 = vst [vmem:[#allocation9] sm:$0xff] %v3719_v41 }
0x201a   :  { %v3620_v42 = vpop.permute.xlu1 %3619 }
0x201b   :  { %3624 = vst.msk [vmem:[#allocation2 + $0x18] sm:$0xff] %vm1956_vm8, %v3620_v42  ;;  %v3618_v43 = vpop.permute.xlu0 %3617 }
0x201c   :  { %3623 = vst.msk [vmem:[#allocation2 + $0x10] sm:$0xff] %vm1956_vm8, %v3618_v43 }
0x2022   :  { %v3628_v47 = vld [vmem:[#allocation2 + $0x18] sm:$0xff] }
0x2023   :  { %v3627_v0 = vld [vmem:[#allocation2 + $0x10] sm:$0xff] }
0x2024   :  { %4321 = vmatprep.mubr.f32.mxu0 %v3627_v0 }
0x2025   :  { %4322 = vmatmul.mubr.f32.gmra.mrb[36].mxu0 %v3628_v47 }
0x20f8   :  { %v4323_v49 = vpop.f32.mrb[36].mxu0 }
0x20f9   :  { %v3734_v50 = vadd.f32 %v4323_v49, %v3855_v23  ;;  %v3728_v51 = vpop.f32.mrb[37].mxu0 }
0x20fa   :  { %v3729_v55 = vadd.f32 %v3855_v23, %v3728_v51 }
0x20fb   :  { %3740 = vst [vmem:[#allocation9 + $0x18] sm:$0xff] %v3734_v50 }
0x20fc   :  { %3739 = vst [vmem:[#allocation9 + $0x10] sm:$0xff] %v3729_v55 }
0x20fd   :  { %4941 = shalt.err (!%p4938_p0)
}
0x20fe   :  { %s4942_s14 = scalar_lea.hbm %s5558_s4, 512 }
0x20ff   :  { %p4943_p1 = scmp.ne.s32.totalorder %s5558_s4, %s4942_s14  ;;  %p4946_p2 = scmp.lt.u32.totalorder %s4942_s14, %s5558_s4 }
0x2101   :  { %p4948_p3 = pnand %p4946_p2, %p4943_p1 }
0x2103   :  { %4951 = shalt.err (!%p4948_p3)
}
0x2104   :  { %3752 = dma.vmem_to_hbm [thread:$0]  %s3747_s10, 512, %s5558_s4, [#allocation5], %s4962_s1, %s4962_s1, %s4963_s13  }
0x2105   :  { %4956 = dma.done.wait [#allocation5], 512  }
0x2106   :  { %4957 = vsyncadd [#allocation5], 4294966784 }
0x2107   :  { %3756 = vsyncpa [#allocation4], 1 }
0x2108   :  { %3757 = vsyncpa [#allocation7], 1 }
0x2109   :  { %3758 = vsyncpa [#allocation5], 1 }

</bundles_post_ra>
